<compile_context>
chip_gen: v6e
topology: v6e:2x2x1
jax: 0.10.0
libtpu: 0.0.40
codegen_flags: <defaults>
</compile_context>

<pallas_src>
import math

import jax
import jax.numpy as jnp
from jax.experimental import pallas as pl
from jax.experimental.pallas import tpu as pltpu

# ---- small-but-consistent config (scaled-down synthetic bert-base) ----------
B = 2            # batch
S = 8            # sequence length
H = 128          # hidden size (lane-aligned)
NH = 2           # attention heads
DH = H // NH     # head dim
FF = 512         # intermediate size (4*H)
L = 2            # encoder layers
VOCAB = 64
NUM_LABELS = 2   # len(LABELS)
NPAD = 128       # lane-padded logits width (sliced to NUM_LABELS outside)
LN_EPS = 1e-12


def _gelu(x):
    # TODO(synk): HF bert-base-cased uses exact erf GELU; tanh approximation
    # kept for EUP-friendly lowering (tiny numerical deviation).
    c = math.sqrt(2.0 / math.pi)
    return 0.5 * x * (1.0 + jnp.tanh(c * (x + 0.044715 * x * x * x)))


def _ln(x, g, b):
    mu = jnp.mean(x, axis=-1, keepdims=True)
    d = x - mu
    var = jnp.mean(d * d, axis=-1, keepdims=True)
    return d * jax.lax.rsqrt(var + LN_EPS) * g + b


# ---- one fused kernel: per-batch full BERT forward ---------------------------
def _fused_bert_kernel(x_ref, m_ref, eg_ref, eb_ref,
                       wqkv_ref, bqkv_ref, wo_ref, bo_ref,
                       ln1g_ref, ln1b_ref,
                       w1_ref, b1_ref, w2_ref, b2_ref,
                       ln2g_ref, ln2b_ref,
                       clsw_ref, clsb_ref,
                       out_ref):
    maskf = m_ref[0]                               # (1, S) float {0,1}
    bias = (1.0 - maskf) * (-10000.0)              # additive key-mask bias
    scale = 1.0 / math.sqrt(DH)

    # embedding LayerNorm (residual-free; dropout = identity at inference)
    x = _ln(x_ref[0], eg_ref[...], eb_ref[...])    # (S, H)

    for l in range(L):                             # L=2, statically unrolled
        # fused Q|K|V projection: (S,H) @ (H,3H) -> (S,3H)
        qkv = (jnp.dot(x, wqkv_ref[l], preferred_element_type=jnp.float32)
               + bqkv_ref[l])
        q = qkv[:, 0:H] * scale                    # scale folded into q
        k = qkv[:, H:2 * H]
        v = qkv[:, 2 * H:3 * H]

        heads = []
        for h in range(NH):                        # heads split on lane axis
            lo, hi = h * DH, (h + 1) * DH
            qh, kh, vh = q[:, lo:hi], k[:, lo:hi], v[:, lo:hi]
            s = jax.lax.dot_general(qh, kh, (((1,), (1,)), ((), ())),
                                    preferred_element_type=jnp.float32) + bias
            s = s - jnp.max(s, axis=-1, keepdims=True)
            p = jnp.exp(s)
            p = p * pl.reciprocal(jnp.sum(p, axis=-1, keepdims=True),
                                  approx=True)
            heads.append(jnp.dot(p, vh, preferred_element_type=jnp.float32))
        ctx = jnp.concatenate(heads, axis=-1)      # lane-dense (S, H)

        # output projection + residual + LN1 (fused)
        attn = (jnp.dot(ctx, wo_ref[l], preferred_element_type=jnp.float32)
                + bo_ref[l])
        x = _ln(attn + x, ln1g_ref[l], ln1b_ref[l])

        # FFN: w1 + GELU + w2 + residual + LN2 (fused, (S,FF) never hits HBM)
        ff = _gelu(jnp.dot(x, w1_ref[l], preferred_element_type=jnp.float32)
                   + b1_ref[l])
        ff = (jnp.dot(ff, w2_ref[l], preferred_element_type=jnp.float32)
              + b2_ref[l])
        x = _ln(ff + x, ln2g_ref[l], ln2b_ref[l])

    # masked-sum pooling as a matmul; dropout = identity; classifier + ReLU.
    # (BertModel's tanh pooler output is unused on this path and not computed.)
    pooled = jnp.dot(maskf, x, preferred_element_type=jnp.float32)      # (1,H)
    logits = jnp.dot(pooled, clsw_ref[...],
                     preferred_element_type=jnp.float32) + clsb_ref[...]
    logits = jnp.maximum(logits, 0.0)                                   # ReLU
    out_ref[0] = jnp.broadcast_to(logits, (8, NPAD))                    # lane-dense store


# ---- deterministic synthetic parameters --------------------------------------
def init_params(key):
    keys = iter(jax.random.split(key, 16))

    def nrm(shape):
        return jax.random.normal(next(keys), shape, jnp.float32) * 0.02

    cls_w = jnp.zeros((H, NPAD), jnp.float32).at[:, :NUM_LABELS].set(
        nrm((H, NUM_LABELS)))
    return {
        "word_emb": nrm((VOCAB, H)),
        "pos_emb": nrm((S, H)),
        "type_emb": nrm((2, H)),
        "emb_ln_g": jnp.ones((1, H), jnp.float32),
        "emb_ln_b": jnp.zeros((1, H), jnp.float32),
        "wqkv": nrm((L, H, 3 * H)),            # wq|wk|wv concatenated on lanes
        "bqkv": jnp.zeros((L, 1, 3 * H), jnp.float32),
        "wo": nrm((L, H, H)),
        "bo": jnp.zeros((L, 1, H), jnp.float32),
        "ln1_g": jnp.ones((L, 1, H), jnp.float32),
        "ln1_b": jnp.zeros((L, 1, H), jnp.float32),
        "w1": nrm((L, H, FF)),
        "b1": jnp.zeros((L, 1, FF), jnp.float32),
        "w2": nrm((L, FF, H)),
        "b2": jnp.zeros((L, 1, H), jnp.float32),
        "ln2_g": jnp.ones((L, 1, H), jnp.float32),
        "ln2_b": jnp.zeros((L, 1, H), jnp.float32),
        "cls_w": cls_w,                        # (H, 128) lane-padded classifier
        "cls_b": jnp.zeros((1, NPAD), jnp.float32),
    }


# ---- forward pass -------------------------------------------------------------
def bert_classifier_forward(params, input_ids, mask):
    maskf = mask.astype(jnp.float32).reshape(B, 1, S)

    # TODO(synk): embedding-table gather stays in plain JAX (no clean tiled form).
    x = (params["word_emb"][input_ids]
         + params["pos_emb"][None, :, :]
         + params["type_emb"][0][None, None, :])          # (B, S, H)

    c2 = lambda b: (0, 0)
    c3 = lambda b: (0, 0, 0)

    out = pl.pallas_call(
        _fused_bert_kernel,
        out_shape=jax.ShapeDtypeStruct((B, 8, NPAD), jnp.float32),
        grid=(B,),
        in_specs=[
            pl.BlockSpec((1, S, H), lambda b: (b, 0, 0)),    # embeddings
            pl.BlockSpec((1, 1, S), lambda b: (b, 0, 0)),    # attention mask
            pl.BlockSpec((1, H), c2), pl.BlockSpec((1, H), c2),          # emb LN g/b
            pl.BlockSpec((L, H, 3 * H), c3), pl.BlockSpec((L, 1, 3 * H), c3),
            pl.BlockSpec((L, H, H), c3), pl.BlockSpec((L, 1, H), c3),
            pl.BlockSpec((L, 1, H), c3), pl.BlockSpec((L, 1, H), c3),    # LN1 g/b
            pl.BlockSpec((L, H, FF), c3), pl.BlockSpec((L, 1, FF), c3),
            pl.BlockSpec((L, FF, H), c3), pl.BlockSpec((L, 1, H), c3),
            pl.BlockSpec((L, 1, H), c3), pl.BlockSpec((L, 1, H), c3),    # LN2 g/b
            pl.BlockSpec((H, NPAD), c2), pl.BlockSpec((1, NPAD), c2),    # classifier
        ],
        out_specs=pl.BlockSpec((1, 8, NPAD), lambda b: (b, 0, 0)),
        compiler_params=pltpu.CompilerParams(
            dimension_semantics=("parallel",)),              # engages 2nd TC on v7x
    )(x, maskf,
      params["emb_ln_g"], params["emb_ln_b"],
      params["wqkv"], params["bqkv"], params["wo"], params["bo"],
      params["ln1_g"], params["ln1_b"],
      params["w1"], params["b1"], params["w2"], params["b2"],
      params["ln2_g"], params["ln2_b"],
      params["cls_w"], params["cls_b"])

    return out[:, 0, :NUM_LABELS]


if __name__ == "__main__":
    key = jax.random.PRNGKey(0)
    pkey, ikey = jax.random.split(key)
    params = init_params(pkey)

    input_ids = jax.random.randint(ikey, (B, S), 0, VOCAB, dtype=jnp.int32)
    mask = jnp.ones((B, S), jnp.int32).at[:, 6:].set(0)   # pad last 2 tokens

    fwd = jax.jit(lambda ids, m: bert_classifier_forward(params, ids, m))
    out = fwd(input_ids, mask)
    jax.block_until_ready(out)
    assert out.shape == (B, NUM_LABELS)
    assert bool(jnp.all(jnp.isfinite(out)))
    print("KERNEL_OK")
</pallas_src>

<mosaic_0001>
module attributes {stable_mosaic.version = 11 : i64} {
  func.func @_fused_bert_kernel(%arg0: i32, %arg1: memref<1x8x128xf32, #tpu.memory_space<vmem>>, %arg2: memref<1x1x8xf32, #tpu.memory_space<vmem>>, %arg3: memref<1x128xf32, #tpu.memory_space<vmem>>, %arg4: memref<1x128xf32, #tpu.memory_space<vmem>>, %arg5: memref<2x128x384xf32, #tpu.memory_space<vmem>>, %arg6: memref<2x1x384xf32, #tpu.memory_space<vmem>>, %arg7: memref<2x128x128xf32, #tpu.memory_space<vmem>>, %arg8: memref<2x1x128xf32, #tpu.memory_space<vmem>>, %arg9: memref<2x1x128xf32, #tpu.memory_space<vmem>>, %arg10: memref<2x1x128xf32, #tpu.memory_space<vmem>>, %arg11: memref<2x128x512xf32, #tpu.memory_space<vmem>>, %arg12: memref<2x1x512xf32, #tpu.memory_space<vmem>>, %arg13: memref<2x512x128xf32, #tpu.memory_space<vmem>>, %arg14: memref<2x1x128xf32, #tpu.memory_space<vmem>>, %arg15: memref<2x1x128xf32, #tpu.memory_space<vmem>>, %arg16: memref<2x1x128xf32, #tpu.memory_space<vmem>>, %arg17: memref<128x128xf32, #tpu.memory_space<vmem>>, %arg18: memref<1x128xf32, #tpu.memory_space<vmem>>, %arg19: memref<1x8x128xf32, #tpu.memory_space<vmem>>) attributes {dimension_semantics = [#tpu.dimension_semantics<parallel>], iteration_bounds = array<i64: 2>, scalar_prefetch = 0 : i64, scratch_operands = 0 : i64, tpu.core_type = #tpu.core_type<tc>, window_params = [{transform_indices = @transform_0, window_bounds = array<i64: 1, 8, 128>}, {transform_indices = @transform_1, window_bounds = array<i64: 1, 1, 8>}, {pipeline_mode = #tpu.pipeline_mode<synchronous>, transform_indices = @transform_2, window_bounds = array<i64: 1, 128>}, {pipeline_mode = #tpu.pipeline_mode<synchronous>, transform_indices = @transform_3, window_bounds = array<i64: 1, 128>}, {pipeline_mode = #tpu.pipeline_mode<synchronous>, transform_indices = @transform_4, window_bounds = array<i64: 2, 128, 384>}, {pipeline_mode = #tpu.pipeline_mode<synchronous>, transform_indices = @transform_5, window_bounds = array<i64: 2, 1, 384>}, {pipeline_mode = #tpu.pipeline_mode<synchronous>, transform_indices = @transform_6, window_bounds = array<i64: 2, 128, 128>}, {pipeline_mode = #tpu.pipeline_mode<synchronous>, transform_indices = @transform_7, window_bounds = array<i64: 2, 1, 128>}, {pipeline_mode = #tpu.pipeline_mode<synchronous>, transform_indices = @transform_8, window_bounds = array<i64: 2, 1, 128>}, {pipeline_mode = #tpu.pipeline_mode<synchronous>, transform_indices = @transform_9, window_bounds = array<i64: 2, 1, 128>}, {pipeline_mode = #tpu.pipeline_mode<synchronous>, transform_indices = @transform_10, window_bounds = array<i64: 2, 128, 512>}, {pipeline_mode = #tpu.pipeline_mode<synchronous>, transform_indices = @transform_11, window_bounds = array<i64: 2, 1, 512>}, {pipeline_mode = #tpu.pipeline_mode<synchronous>, transform_indices = @transform_12, window_bounds = array<i64: 2, 512, 128>}, {pipeline_mode = #tpu.pipeline_mode<synchronous>, transform_indices = @transform_13, window_bounds = array<i64: 2, 1, 128>}, {pipeline_mode = #tpu.pipeline_mode<synchronous>, transform_indices = @transform_14, window_bounds = array<i64: 2, 1, 128>}, {pipeline_mode = #tpu.pipeline_mode<synchronous>, transform_indices = @transform_15, window_bounds = array<i64: 2, 1, 128>}, {pipeline_mode = #tpu.pipeline_mode<synchronous>, transform_indices = @transform_16, window_bounds = array<i64: 128, 128>}, {pipeline_mode = #tpu.pipeline_mode<synchronous>, transform_indices = @transform_17, window_bounds = array<i64: 1, 128>}, {transform_indices = @transform_18, window_bounds = array<i64: 1, 8, 128>}]} {
    %c0 = arith.constant 0 : index
    %c0_0 = arith.constant 0 : index
    %c0_1 = arith.constant 0 : index
    %0 = vector.load %arg2[%c0, %c0_0, %c0_1] : memref<1x1x8xf32, #tpu.memory_space<vmem>>, vector<1x1x8xf32>
    %1 = vector.shape_cast %0 : vector<1x1x8xf32> to vector<1x8xf32>
    %cst = arith.constant 1.000000e+00 : f32
    %2 = vector.broadcast %cst : f32 to vector<1x8xf32>
    %3 = arith.subf %2, %1 : vector<1x8xf32>
    %cst_2 = arith.constant -1.000000e+04 : f32
    %4 = vector.broadcast %cst_2 : f32 to vector<1x8xf32>
    %5 = arith.mulf %3, %4 : vector<1x8xf32>
    %c0_3 = arith.constant 0 : index
    %c0_4 = arith.constant 0 : index
    %c0_5 = arith.constant 0 : index
    %6 = vector.load %arg1[%c0_3, %c0_4, %c0_5] : memref<1x8x128xf32, #tpu.memory_space<vmem>>, vector<1x8x128xf32>
    %7 = vector.shape_cast %6 : vector<1x8x128xf32> to vector<8x128xf32>
    %c0_6 = arith.constant 0 : index
    %c0_7 = arith.constant 0 : index
    %8 = vector.load %arg3[%c0_6, %c0_7] : memref<1x128xf32, #tpu.memory_space<vmem>>, vector<1x128xf32>
    %c0_8 = arith.constant 0 : index
    %c0_9 = arith.constant 0 : index
    %9 = vector.load %arg4[%c0_8, %c0_9] : memref<1x128xf32, #tpu.memory_space<vmem>>, vector<1x128xf32>
    %cst_10 = arith.constant dense<0.000000e+00> : vector<8xf32>
    %10 = vector.multi_reduction <add>, %7, %cst_10 [1] : vector<8x128xf32> to vector<8xf32>
    %11 = vector.shape_cast %10 : vector<8xf32> to vector<8x1xf32>
    %cst_11 = arith.constant 1.280000e+02 : f32
    %12 = vector.broadcast %cst_11 : f32 to vector<8x1xf32>
    %13 = arith.divf %11, %12 : vector<8x1xf32>
    %14 = vector.broadcast %13 : vector<8x1xf32> to vector<8x128xf32>
    %15 = arith.subf %7, %14 : vector<8x128xf32>
    %16 = arith.mulf %15, %15 : vector<8x128xf32>
    %cst_12 = arith.constant dense<0.000000e+00> : vector<8xf32>
    %17 = vector.multi_reduction <add>, %16, %cst_12 [1] : vector<8x128xf32> to vector<8xf32>
    %18 = vector.shape_cast %17 : vector<8xf32> to vector<8x1xf32>
    %cst_13 = arith.constant 1.280000e+02 : f32
    %19 = vector.broadcast %cst_13 : f32 to vector<8x1xf32>
    %20 = arith.divf %18, %19 : vector<8x1xf32>
    %cst_14 = arith.constant 9.99999996E-13 : f32
    %21 = vector.broadcast %cst_14 : f32 to vector<8x1xf32>
    %22 = arith.addf %20, %21 : vector<8x1xf32>
    %23 = math.rsqrt %22 : vector<8x1xf32>
    %24 = vector.broadcast %23 : vector<8x1xf32> to vector<8x128xf32>
    %25 = arith.mulf %15, %24 : vector<8x128xf32>
    %26 = vector.broadcast %8 : vector<1x128xf32> to vector<8x128xf32>
    %27 = arith.mulf %25, %26 : vector<8x128xf32>
    %28 = vector.broadcast %9 : vector<1x128xf32> to vector<8x128xf32>
    %29 = arith.addf %27, %28 : vector<8x128xf32>
    %c0_15 = arith.constant 0 : index
    %c0_16 = arith.constant 0 : index
    %c0_17 = arith.constant 0 : index
    %30 = vector.load %arg5[%c0_15, %c0_16, %c0_17] : memref<2x128x384xf32, #tpu.memory_space<vmem>>, vector<1x128x384xf32>
    %31 = vector.shape_cast %30 : vector<1x128x384xf32> to vector<128x384xf32>
    %cst_18 = arith.constant dense<0.000000e+00> : vector<8x384xf32>
    %32 = tpu.matmul %29, %31, %cst_18 {dimension_numbers = #tpu.dot_dimension_numbers<[1], [0], [0], [1], [0, 0, 1, 1], [], []>} : vector<8x128xf32>, vector<128x384xf32>, vector<8x384xf32> -> vector<8x384xf32>
    %c0_19 = arith.constant 0 : index
    %c0_20 = arith.constant 0 : index
    %c0_21 = arith.constant 0 : index
    %33 = vector.load %arg6[%c0_19, %c0_20, %c0_21] : memref<2x1x384xf32, #tpu.memory_space<vmem>>, vector<1x1x384xf32>
    %34 = vector.shape_cast %33 : vector<1x1x384xf32> to vector<1x384xf32>
    %35 = vector.broadcast %34 : vector<1x384xf32> to vector<8x384xf32>
    %36 = arith.addf %32, %35 : vector<8x384xf32>
    %37 = vector.extract_strided_slice %36 {offsets = [0, 0], sizes = [8, 128], strides = [1, 1]} : vector<8x384xf32> to vector<8x128xf32>
    %cst_22 = arith.constant 1.250000e-01 : f32
    %38 = vector.broadcast %cst_22 : f32 to vector<8x128xf32>
    %39 = arith.mulf %37, %38 : vector<8x128xf32>
    %40 = vector.extract_strided_slice %36 {offsets = [0, 128], sizes = [8, 128], strides = [1, 1]} : vector<8x384xf32> to vector<8x128xf32>
    %41 = vector.extract_strided_slice %36 {offsets = [0, 256], sizes = [8, 128], strides = [1, 1]} : vector<8x384xf32> to vector<8x128xf32>
    %42 = vector.extract_strided_slice %39 {offsets = [0, 0], sizes = [8, 64], strides = [1, 1]} : vector<8x128xf32> to vector<8x64xf32>
    %43 = vector.extract_strided_slice %40 {offsets = [0, 0], sizes = [8, 64], strides = [1, 1]} : vector<8x128xf32> to vector<8x64xf32>
    %44 = vector.extract_strided_slice %41 {offsets = [0, 0], sizes = [8, 64], strides = [1, 1]} : vector<8x128xf32> to vector<8x64xf32>
    %cst_23 = arith.constant dense<0.000000e+00> : vector<8x8xf32>
    %45 = tpu.matmul %42, %43, %cst_23 {dimension_numbers = #tpu.dot_dimension_numbers<[1], [1], [0], [0], [0, 0, 1, 0], [], []>} : vector<8x64xf32>, vector<8x64xf32>, vector<8x8xf32> -> vector<8x8xf32>
    %46 = vector.broadcast %5 : vector<1x8xf32> to vector<8x8xf32>
    %47 = arith.addf %45, %46 : vector<8x8xf32>
    %cst_24 = arith.constant dense<0xFF800000> : vector<8xf32>
    %48 = vector.multi_reduction <maximumf>, %47, %cst_24 [1] : vector<8x8xf32> to vector<8xf32>
    %49 = vector.shape_cast %48 : vector<8xf32> to vector<8x1xf32>
    %50 = vector.broadcast %49 : vector<8x1xf32> to vector<8x8xf32>
    %51 = arith.subf %47, %50 : vector<8x8xf32>
    %52 = math.exp %51 : vector<8x8xf32>
    %cst_25 = arith.constant dense<0.000000e+00> : vector<8xf32>
    %53 = vector.multi_reduction <add>, %52, %cst_25 [1] : vector<8x8xf32> to vector<8xf32>
    %54 = vector.shape_cast %53 : vector<8xf32> to vector<8x1xf32>
    %55 = tpu.reciprocal %54 {approx = true} : vector<8x1xf32> -> vector<8x1xf32>
    %56 = vector.broadcast %55 : vector<8x1xf32> to vector<8x8xf32>
    %57 = arith.mulf %52, %56 : vector<8x8xf32>
    %cst_26 = arith.constant dense<0.000000e+00> : vector<8x64xf32>
    %58 = tpu.matmul %57, %44, %cst_26 {dimension_numbers = #tpu.dot_dimension_numbers<[1], [0], [0], [1], [0, 0, 1, 1], [], []>} : vector<8x8xf32>, vector<8x64xf32>, vector<8x64xf32> -> vector<8x64xf32>
    %59 = vector.extract_strided_slice %39 {offsets = [0, 64], sizes = [8, 64], strides = [1, 1]} : vector<8x128xf32> to vector<8x64xf32>
    %60 = vector.extract_strided_slice %40 {offsets = [0, 64], sizes = [8, 64], strides = [1, 1]} : vector<8x128xf32> to vector<8x64xf32>
    %61 = vector.extract_strided_slice %41 {offsets = [0, 64], sizes = [8, 64], strides = [1, 1]} : vector<8x128xf32> to vector<8x64xf32>
    %cst_27 = arith.constant dense<0.000000e+00> : vector<8x8xf32>
    %62 = tpu.matmul %59, %60, %cst_27 {dimension_numbers = #tpu.dot_dimension_numbers<[1], [1], [0], [0], [0, 0, 1, 0], [], []>} : vector<8x64xf32>, vector<8x64xf32>, vector<8x8xf32> -> vector<8x8xf32>
    %63 = vector.broadcast %5 : vector<1x8xf32> to vector<8x8xf32>
    %64 = arith.addf %62, %63 : vector<8x8xf32>
    %cst_28 = arith.constant dense<0xFF800000> : vector<8xf32>
    %65 = vector.multi_reduction <maximumf>, %64, %cst_28 [1] : vector<8x8xf32> to vector<8xf32>
    %66 = vector.shape_cast %65 : vector<8xf32> to vector<8x1xf32>
    %67 = vector.broadcast %66 : vector<8x1xf32> to vector<8x8xf32>
    %68 = arith.subf %64, %67 : vector<8x8xf32>
    %69 = math.exp %68 : vector<8x8xf32>
    %cst_29 = arith.constant dense<0.000000e+00> : vector<8xf32>
    %70 = vector.multi_reduction <add>, %69, %cst_29 [1] : vector<8x8xf32> to vector<8xf32>
    %71 = vector.shape_cast %70 : vector<8xf32> to vector<8x1xf32>
    %72 = tpu.reciprocal %71 {approx = true} : vector<8x1xf32> -> vector<8x1xf32>
    %73 = vector.broadcast %72 : vector<8x1xf32> to vector<8x8xf32>
    %74 = arith.mulf %69, %73 : vector<8x8xf32>
    %cst_30 = arith.constant dense<0.000000e+00> : vector<8x64xf32>
    %75 = tpu.matmul %74, %61, %cst_30 {dimension_numbers = #tpu.dot_dimension_numbers<[1], [0], [0], [1], [0, 0, 1, 1], [], []>} : vector<8x8xf32>, vector<8x64xf32>, vector<8x64xf32> -> vector<8x64xf32>
    %76 = tpu.concatenate %58, %75 in 1 : vector<8x64xf32>, vector<8x64xf32> -> vector<8x128xf32>
    %c0_31 = arith.constant 0 : index
    %c0_32 = arith.constant 0 : index
    %c0_33 = arith.constant 0 : index
    %77 = vector.load %arg7[%c0_31, %c0_32, %c0_33] : memref<2x128x128xf32, #tpu.memory_space<vmem>>, vector<1x128x128xf32>
    %78 = vector.shape_cast %77 : vector<1x128x128xf32> to vector<128x128xf32>
    %cst_34 = arith.constant dense<0.000000e+00> : vector<8x128xf32>
    %79 = tpu.matmul %76, %78, %cst_34 {dimension_numbers = #tpu.dot_dimension_numbers<[1], [0], [0], [1], [0, 0, 1, 1], [], []>} : vector<8x128xf32>, vector<128x128xf32>, vector<8x128xf32> -> vector<8x128xf32>
    %c0_35 = arith.constant 0 : index
    %c0_36 = arith.constant 0 : index
    %c0_37 = arith.constant 0 : index
    %80 = vector.load %arg8[%c0_35, %c0_36, %c0_37] : memref<2x1x128xf32, #tpu.memory_space<vmem>>, vector<1x1x128xf32>
    %81 = vector.shape_cast %80 : vector<1x1x128xf32> to vector<1x128xf32>
    %82 = vector.broadcast %81 : vector<1x128xf32> to vector<8x128xf32>
    %83 = arith.addf %79, %82 : vector<8x128xf32>
    %84 = arith.addf %83, %29 : vector<8x128xf32>
    %c0_38 = arith.constant 0 : index
    %c0_39 = arith.constant 0 : index
    %c0_40 = arith.constant 0 : index
    %85 = vector.load %arg9[%c0_38, %c0_39, %c0_40] : memref<2x1x128xf32, #tpu.memory_space<vmem>>, vector<1x1x128xf32>
    %86 = vector.shape_cast %85 : vector<1x1x128xf32> to vector<1x128xf32>
    %c0_41 = arith.constant 0 : index
    %c0_42 = arith.constant 0 : index
    %c0_43 = arith.constant 0 : index
    %87 = vector.load %arg10[%c0_41, %c0_42, %c0_43] : memref<2x1x128xf32, #tpu.memory_space<vmem>>, vector<1x1x128xf32>
    %88 = vector.shape_cast %87 : vector<1x1x128xf32> to vector<1x128xf32>
    %cst_44 = arith.constant dense<0.000000e+00> : vector<8xf32>
    %89 = vector.multi_reduction <add>, %84, %cst_44 [1] : vector<8x128xf32> to vector<8xf32>
    %90 = vector.shape_cast %89 : vector<8xf32> to vector<8x1xf32>
    %cst_45 = arith.constant 1.280000e+02 : f32
    %91 = vector.broadcast %cst_45 : f32 to vector<8x1xf32>
    %92 = arith.divf %90, %91 : vector<8x1xf32>
    %93 = vector.broadcast %92 : vector<8x1xf32> to vector<8x128xf32>
    %94 = arith.subf %84, %93 : vector<8x128xf32>
    %95 = arith.mulf %94, %94 : vector<8x128xf32>
    %cst_46 = arith.constant dense<0.000000e+00> : vector<8xf32>
    %96 = vector.multi_reduction <add>, %95, %cst_46 [1] : vector<8x128xf32> to vector<8xf32>
    %97 = vector.shape_cast %96 : vector<8xf32> to vector<8x1xf32>
    %cst_47 = arith.constant 1.280000e+02 : f32
    %98 = vector.broadcast %cst_47 : f32 to vector<8x1xf32>
    %99 = arith.divf %97, %98 : vector<8x1xf32>
    %cst_48 = arith.constant 9.99999996E-13 : f32
    %100 = vector.broadcast %cst_48 : f32 to vector<8x1xf32>
    %101 = arith.addf %99, %100 : vector<8x1xf32>
    %102 = math.rsqrt %101 : vector<8x1xf32>
    %103 = vector.broadcast %102 : vector<8x1xf32> to vector<8x128xf32>
    %104 = arith.mulf %94, %103 : vector<8x128xf32>
    %105 = vector.broadcast %86 : vector<1x128xf32> to vector<8x128xf32>
    %106 = arith.mulf %104, %105 : vector<8x128xf32>
    %107 = vector.broadcast %88 : vector<1x128xf32> to vector<8x128xf32>
    %108 = arith.addf %106, %107 : vector<8x128xf32>
    %c0_49 = arith.constant 0 : index
    %c0_50 = arith.constant 0 : index
    %c0_51 = arith.constant 0 : index
    %109 = vector.load %arg11[%c0_49, %c0_50, %c0_51] : memref<2x128x512xf32, #tpu.memory_space<vmem>>, vector<1x128x512xf32>
    %110 = vector.shape_cast %109 : vector<1x128x512xf32> to vector<128x512xf32>
    %cst_52 = arith.constant dense<0.000000e+00> : vector<8x512xf32>
    %111 = tpu.matmul %108, %110, %cst_52 {dimension_numbers = #tpu.dot_dimension_numbers<[1], [0], [0], [1], [0, 0, 1, 1], [], []>} : vector<8x128xf32>, vector<128x512xf32>, vector<8x512xf32> -> vector<8x512xf32>
    %c0_53 = arith.constant 0 : index
    %c0_54 = arith.constant 0 : index
    %c0_55 = arith.constant 0 : index
    %112 = vector.load %arg12[%c0_53, %c0_54, %c0_55] : memref<2x1x512xf32, #tpu.memory_space<vmem>>, vector<1x1x512xf32>
    %113 = vector.shape_cast %112 : vector<1x1x512xf32> to vector<1x512xf32>
    %114 = vector.broadcast %113 : vector<1x512xf32> to vector<8x512xf32>
    %115 = arith.addf %111, %114 : vector<8x512xf32>
    %cst_56 = arith.constant 5.000000e-01 : f32
    %116 = vector.broadcast %cst_56 : f32 to vector<8x512xf32>
    %117 = arith.mulf %116, %115 : vector<8x512xf32>
    %cst_57 = arith.constant 4.471500e-02 : f32
    %118 = vector.broadcast %cst_57 : f32 to vector<8x512xf32>
    %119 = arith.mulf %118, %115 : vector<8x512xf32>
    %120 = arith.mulf %119, %115 : vector<8x512xf32>
    %121 = arith.mulf %120, %115 : vector<8x512xf32>
    %122 = arith.addf %115, %121 : vector<8x512xf32>
    %cst_58 = arith.constant 0.797884583 : f32
    %123 = vector.broadcast %cst_58 : f32 to vector<8x512xf32>
    %124 = arith.mulf %123, %122 : vector<8x512xf32>
    %125 = math.tanh %124 : vector<8x512xf32>
    %cst_59 = arith.constant 1.000000e+00 : f32
    %126 = vector.broadcast %cst_59 : f32 to vector<8x512xf32>
    %127 = arith.addf %126, %125 : vector<8x512xf32>
    %128 = arith.mulf %117, %127 : vector<8x512xf32>
    %c0_60 = arith.constant 0 : index
    %c0_61 = arith.constant 0 : index
    %c0_62 = arith.constant 0 : index
    %129 = vector.load %arg13[%c0_60, %c0_61, %c0_62] : memref<2x512x128xf32, #tpu.memory_space<vmem>>, vector<1x512x128xf32>
    %130 = vector.shape_cast %129 : vector<1x512x128xf32> to vector<512x128xf32>
    %cst_63 = arith.constant dense<0.000000e+00> : vector<8x128xf32>
    %131 = tpu.matmul %128, %130, %cst_63 {dimension_numbers = #tpu.dot_dimension_numbers<[1], [0], [0], [1], [0, 0, 1, 1], [], []>} : vector<8x512xf32>, vector<512x128xf32>, vector<8x128xf32> -> vector<8x128xf32>
    %c0_64 = arith.constant 0 : index
    %c0_65 = arith.constant 0 : index
    %c0_66 = arith.constant 0 : index
    %132 = vector.load %arg14[%c0_64, %c0_65, %c0_66] : memref<2x1x128xf32, #tpu.memory_space<vmem>>, vector<1x1x128xf32>
    %133 = vector.shape_cast %132 : vector<1x1x128xf32> to vector<1x128xf32>
    %134 = vector.broadcast %133 : vector<1x128xf32> to vector<8x128xf32>
    %135 = arith.addf %131, %134 : vector<8x128xf32>
    %136 = arith.addf %135, %108 : vector<8x128xf32>
    %c0_67 = arith.constant 0 : index
    %c0_68 = arith.constant 0 : index
    %c0_69 = arith.constant 0 : index
    %137 = vector.load %arg15[%c0_67, %c0_68, %c0_69] : memref<2x1x128xf32, #tpu.memory_space<vmem>>, vector<1x1x128xf32>
    %138 = vector.shape_cast %137 : vector<1x1x128xf32> to vector<1x128xf32>
    %c0_70 = arith.constant 0 : index
    %c0_71 = arith.constant 0 : index
    %c0_72 = arith.constant 0 : index
    %139 = vector.load %arg16[%c0_70, %c0_71, %c0_72] : memref<2x1x128xf32, #tpu.memory_space<vmem>>, vector<1x1x128xf32>
    %140 = vector.shape_cast %139 : vector<1x1x128xf32> to vector<1x128xf32>
    %cst_73 = arith.constant dense<0.000000e+00> : vector<8xf32>
    %141 = vector.multi_reduction <add>, %136, %cst_73 [1] : vector<8x128xf32> to vector<8xf32>
    %142 = vector.shape_cast %141 : vector<8xf32> to vector<8x1xf32>
    %cst_74 = arith.constant 1.280000e+02 : f32
    %143 = vector.broadcast %cst_74 : f32 to vector<8x1xf32>
    %144 = arith.divf %142, %143 : vector<8x1xf32>
    %145 = vector.broadcast %144 : vector<8x1xf32> to vector<8x128xf32>
    %146 = arith.subf %136, %145 : vector<8x128xf32>
    %147 = arith.mulf %146, %146 : vector<8x128xf32>
    %cst_75 = arith.constant dense<0.000000e+00> : vector<8xf32>
    %148 = vector.multi_reduction <add>, %147, %cst_75 [1] : vector<8x128xf32> to vector<8xf32>
    %149 = vector.shape_cast %148 : vector<8xf32> to vector<8x1xf32>
    %cst_76 = arith.constant 1.280000e+02 : f32
    %150 = vector.broadcast %cst_76 : f32 to vector<8x1xf32>
    %151 = arith.divf %149, %150 : vector<8x1xf32>
    %cst_77 = arith.constant 9.99999996E-13 : f32
    %152 = vector.broadcast %cst_77 : f32 to vector<8x1xf32>
    %153 = arith.addf %151, %152 : vector<8x1xf32>
    %154 = math.rsqrt %153 : vector<8x1xf32>
    %155 = vector.broadcast %154 : vector<8x1xf32> to vector<8x128xf32>
    %156 = arith.mulf %146, %155 : vector<8x128xf32>
    %157 = vector.broadcast %138 : vector<1x128xf32> to vector<8x128xf32>
    %158 = arith.mulf %156, %157 : vector<8x128xf32>
    %159 = vector.broadcast %140 : vector<1x128xf32> to vector<8x128xf32>
    %160 = arith.addf %158, %159 : vector<8x128xf32>
    %c1 = arith.constant 1 : index
    %c0_78 = arith.constant 0 : index
    %c0_79 = arith.constant 0 : index
    %161 = vector.load %arg5[%c1, %c0_78, %c0_79] : memref<2x128x384xf32, #tpu.memory_space<vmem>>, vector<1x128x384xf32>
    %162 = vector.shape_cast %161 : vector<1x128x384xf32> to vector<128x384xf32>
    %cst_80 = arith.constant dense<0.000000e+00> : vector<8x384xf32>
    %163 = tpu.matmul %160, %162, %cst_80 {dimension_numbers = #tpu.dot_dimension_numbers<[1], [0], [0], [1], [0, 0, 1, 1], [], []>} : vector<8x128xf32>, vector<128x384xf32>, vector<8x384xf32> -> vector<8x384xf32>
    %c1_81 = arith.constant 1 : index
    %c0_82 = arith.constant 0 : index
    %c0_83 = arith.constant 0 : index
    %164 = vector.load %arg6[%c1_81, %c0_82, %c0_83] : memref<2x1x384xf32, #tpu.memory_space<vmem>>, vector<1x1x384xf32>
    %165 = vector.shape_cast %164 : vector<1x1x384xf32> to vector<1x384xf32>
    %166 = vector.broadcast %165 : vector<1x384xf32> to vector<8x384xf32>
    %167 = arith.addf %163, %166 : vector<8x384xf32>
    %168 = vector.extract_strided_slice %167 {offsets = [0, 0], sizes = [8, 128], strides = [1, 1]} : vector<8x384xf32> to vector<8x128xf32>
    %cst_84 = arith.constant 1.250000e-01 : f32
    %169 = vector.broadcast %cst_84 : f32 to vector<8x128xf32>
    %170 = arith.mulf %168, %169 : vector<8x128xf32>
    %171 = vector.extract_strided_slice %167 {offsets = [0, 128], sizes = [8, 128], strides = [1, 1]} : vector<8x384xf32> to vector<8x128xf32>
    %172 = vector.extract_strided_slice %167 {offsets = [0, 256], sizes = [8, 128], strides = [1, 1]} : vector<8x384xf32> to vector<8x128xf32>
    %173 = vector.extract_strided_slice %170 {offsets = [0, 0], sizes = [8, 64], strides = [1, 1]} : vector<8x128xf32> to vector<8x64xf32>
    %174 = vector.extract_strided_slice %171 {offsets = [0, 0], sizes = [8, 64], strides = [1, 1]} : vector<8x128xf32> to vector<8x64xf32>
    %175 = vector.extract_strided_slice %172 {offsets = [0, 0], sizes = [8, 64], strides = [1, 1]} : vector<8x128xf32> to vector<8x64xf32>
    %cst_85 = arith.constant dense<0.000000e+00> : vector<8x8xf32>
    %176 = tpu.matmul %173, %174, %cst_85 {dimension_numbers = #tpu.dot_dimension_numbers<[1], [1], [0], [0], [0, 0, 1, 0], [], []>} : vector<8x64xf32>, vector<8x64xf32>, vector<8x8xf32> -> vector<8x8xf32>
    %177 = vector.broadcast %5 : vector<1x8xf32> to vector<8x8xf32>
    %178 = arith.addf %176, %177 : vector<8x8xf32>
    %cst_86 = arith.constant dense<0xFF800000> : vector<8xf32>
    %179 = vector.multi_reduction <maximumf>, %178, %cst_86 [1] : vector<8x8xf32> to vector<8xf32>
    %180 = vector.shape_cast %179 : vector<8xf32> to vector<8x1xf32>
    %181 = vector.broadcast %180 : vector<8x1xf32> to vector<8x8xf32>
    %182 = arith.subf %178, %181 : vector<8x8xf32>
    %183 = math.exp %182 : vector<8x8xf32>
    %cst_87 = arith.constant dense<0.000000e+00> : vector<8xf32>
    %184 = vector.multi_reduction <add>, %183, %cst_87 [1] : vector<8x8xf32> to vector<8xf32>
    %185 = vector.shape_cast %184 : vector<8xf32> to vector<8x1xf32>
    %186 = tpu.reciprocal %185 {approx = true} : vector<8x1xf32> -> vector<8x1xf32>
    %187 = vector.broadcast %186 : vector<8x1xf32> to vector<8x8xf32>
    %188 = arith.mulf %183, %187 : vector<8x8xf32>
    %cst_88 = arith.constant dense<0.000000e+00> : vector<8x64xf32>
    %189 = tpu.matmul %188, %175, %cst_88 {dimension_numbers = #tpu.dot_dimension_numbers<[1], [0], [0], [1], [0, 0, 1, 1], [], []>} : vector<8x8xf32>, vector<8x64xf32>, vector<8x64xf32> -> vector<8x64xf32>
    %190 = vector.extract_strided_slice %170 {offsets = [0, 64], sizes = [8, 64], strides = [1, 1]} : vector<8x128xf32> to vector<8x64xf32>
    %191 = vector.extract_strided_slice %171 {offsets = [0, 64], sizes = [8, 64], strides = [1, 1]} : vector<8x128xf32> to vector<8x64xf32>
    %192 = vector.extract_strided_slice %172 {offsets = [0, 64], sizes = [8, 64], strides = [1, 1]} : vector<8x128xf32> to vector<8x64xf32>
    %cst_89 = arith.constant dense<0.000000e+00> : vector<8x8xf32>
    %193 = tpu.matmul %190, %191, %cst_89 {dimension_numbers = #tpu.dot_dimension_numbers<[1], [1], [0], [0], [0, 0, 1, 0], [], []>} : vector<8x64xf32>, vector<8x64xf32>, vector<8x8xf32> -> vector<8x8xf32>
    %194 = vector.broadcast %5 : vector<1x8xf32> to vector<8x8xf32>
    %195 = arith.addf %193, %194 : vector<8x8xf32>
    %cst_90 = arith.constant dense<0xFF800000> : vector<8xf32>
    %196 = vector.multi_reduction <maximumf>, %195, %cst_90 [1] : vector<8x8xf32> to vector<8xf32>
    %197 = vector.shape_cast %196 : vector<8xf32> to vector<8x1xf32>
    %198 = vector.broadcast %197 : vector<8x1xf32> to vector<8x8xf32>
    %199 = arith.subf %195, %198 : vector<8x8xf32>
    %200 = math.exp %199 : vector<8x8xf32>
    %cst_91 = arith.constant dense<0.000000e+00> : vector<8xf32>
    %201 = vector.multi_reduction <add>, %200, %cst_91 [1] : vector<8x8xf32> to vector<8xf32>
    %202 = vector.shape_cast %201 : vector<8xf32> to vector<8x1xf32>
    %203 = tpu.reciprocal %202 {approx = true} : vector<8x1xf32> -> vector<8x1xf32>
    %204 = vector.broadcast %203 : vector<8x1xf32> to vector<8x8xf32>
    %205 = arith.mulf %200, %204 : vector<8x8xf32>
    %cst_92 = arith.constant dense<0.000000e+00> : vector<8x64xf32>
    %206 = tpu.matmul %205, %192, %cst_92 {dimension_numbers = #tpu.dot_dimension_numbers<[1], [0], [0], [1], [0, 0, 1, 1], [], []>} : vector<8x8xf32>, vector<8x64xf32>, vector<8x64xf32> -> vector<8x64xf32>
    %207 = tpu.concatenate %189, %206 in 1 : vector<8x64xf32>, vector<8x64xf32> -> vector<8x128xf32>
    %c1_93 = arith.constant 1 : index
    %c0_94 = arith.constant 0 : index
    %c0_95 = arith.constant 0 : index
    %208 = vector.load %arg7[%c1_93, %c0_94, %c0_95] : memref<2x128x128xf32, #tpu.memory_space<vmem>>, vector<1x128x128xf32>
    %209 = vector.shape_cast %208 : vector<1x128x128xf32> to vector<128x128xf32>
    %cst_96 = arith.constant dense<0.000000e+00> : vector<8x128xf32>
    %210 = tpu.matmul %207, %209, %cst_96 {dimension_numbers = #tpu.dot_dimension_numbers<[1], [0], [0], [1], [0, 0, 1, 1], [], []>} : vector<8x128xf32>, vector<128x128xf32>, vector<8x128xf32> -> vector<8x128xf32>
    %c1_97 = arith.constant 1 : index
    %c0_98 = arith.constant 0 : index
    %c0_99 = arith.constant 0 : index
    %211 = vector.load %arg8[%c1_97, %c0_98, %c0_99] : memref<2x1x128xf32, #tpu.memory_space<vmem>>, vector<1x1x128xf32>
    %212 = vector.shape_cast %211 : vector<1x1x128xf32> to vector<1x128xf32>
    %213 = vector.broadcast %212 : vector<1x128xf32> to vector<8x128xf32>
    %214 = arith.addf %210, %213 : vector<8x128xf32>
    %215 = arith.addf %214, %160 : vector<8x128xf32>
    %c1_100 = arith.constant 1 : index
    %c0_101 = arith.constant 0 : index
    %c0_102 = arith.constant 0 : index
    %216 = vector.load %arg9[%c1_100, %c0_101, %c0_102] : memref<2x1x128xf32, #tpu.memory_space<vmem>>, vector<1x1x128xf32>
    %217 = vector.shape_cast %216 : vector<1x1x128xf32> to vector<1x128xf32>
    %c1_103 = arith.constant 1 : index
    %c0_104 = arith.constant 0 : index
    %c0_105 = arith.constant 0 : index
    %218 = vector.load %arg10[%c1_103, %c0_104, %c0_105] : memref<2x1x128xf32, #tpu.memory_space<vmem>>, vector<1x1x128xf32>
    %219 = vector.shape_cast %218 : vector<1x1x128xf32> to vector<1x128xf32>
    %cst_106 = arith.constant dense<0.000000e+00> : vector<8xf32>
    %220 = vector.multi_reduction <add>, %215, %cst_106 [1] : vector<8x128xf32> to vector<8xf32>
    %221 = vector.shape_cast %220 : vector<8xf32> to vector<8x1xf32>
    %cst_107 = arith.constant 1.280000e+02 : f32
    %222 = vector.broadcast %cst_107 : f32 to vector<8x1xf32>
    %223 = arith.divf %221, %222 : vector<8x1xf32>
    %224 = vector.broadcast %223 : vector<8x1xf32> to vector<8x128xf32>
    %225 = arith.subf %215, %224 : vector<8x128xf32>
    %226 = arith.mulf %225, %225 : vector<8x128xf32>
    %cst_108 = arith.constant dense<0.000000e+00> : vector<8xf32>
    %227 = vector.multi_reduction <add>, %226, %cst_108 [1] : vector<8x128xf32> to vector<8xf32>
    %228 = vector.shape_cast %227 : vector<8xf32> to vector<8x1xf32>
    %cst_109 = arith.constant 1.280000e+02 : f32
    %229 = vector.broadcast %cst_109 : f32 to vector<8x1xf32>
    %230 = arith.divf %228, %229 : vector<8x1xf32>
    %cst_110 = arith.constant 9.99999996E-13 : f32
    %231 = vector.broadcast %cst_110 : f32 to vector<8x1xf32>
    %232 = arith.addf %230, %231 : vector<8x1xf32>
    %233 = math.rsqrt %232 : vector<8x1xf32>
    %234 = vector.broadcast %233 : vector<8x1xf32> to vector<8x128xf32>
    %235 = arith.mulf %225, %234 : vector<8x128xf32>
    %236 = vector.broadcast %217 : vector<1x128xf32> to vector<8x128xf32>
    %237 = arith.mulf %235, %236 : vector<8x128xf32>
    %238 = vector.broadcast %219 : vector<1x128xf32> to vector<8x128xf32>
    %239 = arith.addf %237, %238 : vector<8x128xf32>
    %c1_111 = arith.constant 1 : index
    %c0_112 = arith.constant 0 : index
    %c0_113 = arith.constant 0 : index
    %240 = vector.load %arg11[%c1_111, %c0_112, %c0_113] : memref<2x128x512xf32, #tpu.memory_space<vmem>>, vector<1x128x512xf32>
    %241 = vector.shape_cast %240 : vector<1x128x512xf32> to vector<128x512xf32>
    %cst_114 = arith.constant dense<0.000000e+00> : vector<8x512xf32>
    %242 = tpu.matmul %239, %241, %cst_114 {dimension_numbers = #tpu.dot_dimension_numbers<[1], [0], [0], [1], [0, 0, 1, 1], [], []>} : vector<8x128xf32>, vector<128x512xf32>, vector<8x512xf32> -> vector<8x512xf32>
    %c1_115 = arith.constant 1 : index
    %c0_116 = arith.constant 0 : index
    %c0_117 = arith.constant 0 : index
    %243 = vector.load %arg12[%c1_115, %c0_116, %c0_117] : memref<2x1x512xf32, #tpu.memory_space<vmem>>, vector<1x1x512xf32>
    %244 = vector.shape_cast %243 : vector<1x1x512xf32> to vector<1x512xf32>
    %245 = vector.broadcast %244 : vector<1x512xf32> to vector<8x512xf32>
    %246 = arith.addf %242, %245 : vector<8x512xf32>
    %cst_118 = arith.constant 5.000000e-01 : f32
    %247 = vector.broadcast %cst_118 : f32 to vector<8x512xf32>
    %248 = arith.mulf %247, %246 : vector<8x512xf32>
    %cst_119 = arith.constant 4.471500e-02 : f32
    %249 = vector.broadcast %cst_119 : f32 to vector<8x512xf32>
    %250 = arith.mulf %249, %246 : vector<8x512xf32>
    %251 = arith.mulf %250, %246 : vector<8x512xf32>
    %252 = arith.mulf %251, %246 : vector<8x512xf32>
    %253 = arith.addf %246, %252 : vector<8x512xf32>
    %cst_120 = arith.constant 0.797884583 : f32
    %254 = vector.broadcast %cst_120 : f32 to vector<8x512xf32>
    %255 = arith.mulf %254, %253 : vector<8x512xf32>
    %256 = math.tanh %255 : vector<8x512xf32>
    %cst_121 = arith.constant 1.000000e+00 : f32
    %257 = vector.broadcast %cst_121 : f32 to vector<8x512xf32>
    %258 = arith.addf %257, %256 : vector<8x512xf32>
    %259 = arith.mulf %248, %258 : vector<8x512xf32>
    %c1_122 = arith.constant 1 : index
    %c0_123 = arith.constant 0 : index
    %c0_124 = arith.constant 0 : index
    %260 = vector.load %arg13[%c1_122, %c0_123, %c0_124] : memref<2x512x128xf32, #tpu.memory_space<vmem>>, vector<1x512x128xf32>
    %261 = vector.shape_cast %260 : vector<1x512x128xf32> to vector<512x128xf32>
    %cst_125 = arith.constant dense<0.000000e+00> : vector<8x128xf32>
    %262 = tpu.matmul %259, %261, %cst_125 {dimension_numbers = #tpu.dot_dimension_numbers<[1], [0], [0], [1], [0, 0, 1, 1], [], []>} : vector<8x512xf32>, vector<512x128xf32>, vector<8x128xf32> -> vector<8x128xf32>
    %c1_126 = arith.constant 1 : index
    %c0_127 = arith.constant 0 : index
    %c0_128 = arith.constant 0 : index
    %263 = vector.load %arg14[%c1_126, %c0_127, %c0_128] : memref<2x1x128xf32, #tpu.memory_space<vmem>>, vector<1x1x128xf32>
    %264 = vector.shape_cast %263 : vector<1x1x128xf32> to vector<1x128xf32>
    %265 = vector.broadcast %264 : vector<1x128xf32> to vector<8x128xf32>
    %266 = arith.addf %262, %265 : vector<8x128xf32>
    %267 = arith.addf %266, %239 : vector<8x128xf32>
    %c1_129 = arith.constant 1 : index
    %c0_130 = arith.constant 0 : index
    %c0_131 = arith.constant 0 : index
    %268 = vector.load %arg15[%c1_129, %c0_130, %c0_131] : memref<2x1x128xf32, #tpu.memory_space<vmem>>, vector<1x1x128xf32>
    %269 = vector.shape_cast %268 : vector<1x1x128xf32> to vector<1x128xf32>
    %c1_132 = arith.constant 1 : index
    %c0_133 = arith.constant 0 : index
    %c0_134 = arith.constant 0 : index
    %270 = vector.load %arg16[%c1_132, %c0_133, %c0_134] : memref<2x1x128xf32, #tpu.memory_space<vmem>>, vector<1x1x128xf32>
    %271 = vector.shape_cast %270 : vector<1x1x128xf32> to vector<1x128xf32>
    %cst_135 = arith.constant dense<0.000000e+00> : vector<8xf32>
    %272 = vector.multi_reduction <add>, %267, %cst_135 [1] : vector<8x128xf32> to vector<8xf32>
    %273 = vector.shape_cast %272 : vector<8xf32> to vector<8x1xf32>
    %cst_136 = arith.constant 1.280000e+02 : f32
    %274 = vector.broadcast %cst_136 : f32 to vector<8x1xf32>
    %275 = arith.divf %273, %274 : vector<8x1xf32>
    %276 = vector.broadcast %275 : vector<8x1xf32> to vector<8x128xf32>
    %277 = arith.subf %267, %276 : vector<8x128xf32>
    %278 = arith.mulf %277, %277 : vector<8x128xf32>
    %cst_137 = arith.constant dense<0.000000e+00> : vector<8xf32>
    %279 = vector.multi_reduction <add>, %278, %cst_137 [1] : vector<8x128xf32> to vector<8xf32>
    %280 = vector.shape_cast %279 : vector<8xf32> to vector<8x1xf32>
    %cst_138 = arith.constant 1.280000e+02 : f32
    %281 = vector.broadcast %cst_138 : f32 to vector<8x1xf32>
    %282 = arith.divf %280, %281 : vector<8x1xf32>
    %cst_139 = arith.constant 9.99999996E-13 : f32
    %283 = vector.broadcast %cst_139 : f32 to vector<8x1xf32>
    %284 = arith.addf %282, %283 : vector<8x1xf32>
    %285 = math.rsqrt %284 : vector<8x1xf32>
    %286 = vector.broadcast %285 : vector<8x1xf32> to vector<8x128xf32>
    %287 = arith.mulf %277, %286 : vector<8x128xf32>
    %288 = vector.broadcast %269 : vector<1x128xf32> to vector<8x128xf32>
    %289 = arith.mulf %287, %288 : vector<8x128xf32>
    %290 = vector.broadcast %271 : vector<1x128xf32> to vector<8x128xf32>
    %291 = arith.addf %289, %290 : vector<8x128xf32>
    %cst_140 = arith.constant dense<0.000000e+00> : vector<1x128xf32>
    %292 = tpu.matmul %1, %291, %cst_140 {dimension_numbers = #tpu.dot_dimension_numbers<[1], [0], [0], [1], [0, 0, 1, 1], [], []>} : vector<1x8xf32>, vector<8x128xf32>, vector<1x128xf32> -> vector<1x128xf32>
    %c0_141 = arith.constant 0 : index
    %c0_142 = arith.constant 0 : index
    %293 = vector.load %arg17[%c0_141, %c0_142] : memref<128x128xf32, #tpu.memory_space<vmem>>, vector<128x128xf32>
    %cst_143 = arith.constant dense<0.000000e+00> : vector<1x128xf32>
    %294 = tpu.matmul %292, %293, %cst_143 {dimension_numbers = #tpu.dot_dimension_numbers<[1], [0], [0], [1], [0, 0, 1, 1], [], []>} : vector<1x128xf32>, vector<128x128xf32>, vector<1x128xf32> -> vector<1x128xf32>
    %c0_144 = arith.constant 0 : index
    %c0_145 = arith.constant 0 : index
    %295 = vector.load %arg18[%c0_144, %c0_145] : memref<1x128xf32, #tpu.memory_space<vmem>>, vector<1x128xf32>
    %296 = arith.addf %294, %295 : vector<1x128xf32>
    %cst_146 = arith.constant 0.000000e+00 : f32
    %297 = vector.broadcast %cst_146 : f32 to vector<1x128xf32>
    %298 = arith.maximumf %296, %297 : vector<1x128xf32>
    %299 = vector.shape_cast %298 : vector<1x128xf32> to vector<1x128xf32>
    %300 = vector.broadcast %299 : vector<1x128xf32> to vector<8x128xf32>
    %c0_147 = arith.constant 0 : index
    %c0_148 = arith.constant 0 : index
    %c0_149 = arith.constant 0 : index
    %301 = vector.load %arg19[%c0_147, %c0_148, %c0_149] : memref<1x8x128xf32, #tpu.memory_space<vmem>>, vector<1x8x128xf32>
    %302 = vector.shape_cast %301 : vector<1x8x128xf32> to vector<8x128xf32>
    %303 = vector.shape_cast %300 : vector<8x128xf32> to vector<1x8x128xf32>
    tpu.vector_store %arg19[%c0_147, %c0_148, %c0_149], %303 {strides = array<i32>} : memref<1x8x128xf32, #tpu.memory_space<vmem>>, vector<1x8x128xf32>,
    return
  }
  func.func @transform_0(%arg0: i32) -> (i32, i32, i32) {
    %c0_i32 = arith.constant 0 : i32
    %c0_i32_0 = arith.constant 0 : i32
    %c0_i32_1 = arith.constant 0 : i32
    return %arg0, %c0_i32, %c0_i32_0 : i32, i32, i32
  }
  func.func @transform_1(%arg0: i32) -> (i32, i32, i32) {
    %c0_i32 = arith.constant 0 : i32
    %c0_i32_0 = arith.constant 0 : i32
    %c0_i32_1 = arith.constant 0 : i32
    return %arg0, %c0_i32, %c0_i32_0 : i32, i32, i32
  }
  func.func @transform_2(%arg0: i32) -> (i32, i32) {
    %c0_i32 = arith.constant 0 : i32
    %c0_i32_0 = arith.constant 0 : i32
    %c0_i32_1 = arith.constant 0 : i32
    return %c0_i32, %c0_i32_0 : i32, i32
  }
  func.func @transform_3(%arg0: i32) -> (i32, i32) {
    %c0_i32 = arith.constant 0 : i32
    %c0_i32_0 = arith.constant 0 : i32
    %c0_i32_1 = arith.constant 0 : i32
    return %c0_i32, %c0_i32_0 : i32, i32
  }
  func.func @transform_4(%arg0: i32) -> (i32, i32, i32) {
    %c0_i32 = arith.constant 0 : i32
    %c0_i32_0 = arith.constant 0 : i32
    %c0_i32_1 = arith.constant 0 : i32
    %c0_i32_2 = arith.constant 0 : i32
    return %c0_i32, %c0_i32_0, %c0_i32_1 : i32, i32, i32
  }
  func.func @transform_5(%arg0: i32) -> (i32, i32, i32) {
    %c0_i32 = arith.constant 0 : i32
    %c0_i32_0 = arith.constant 0 : i32
    %c0_i32_1 = arith.constant 0 : i32
    %c0_i32_2 = arith.constant 0 : i32
    return %c0_i32, %c0_i32_0, %c0_i32_1 : i32, i32, i32
  }
  func.func @transform_6(%arg0: i32) -> (i32, i32, i32) {
    %c0_i32 = arith.constant 0 : i32
    %c0_i32_0 = arith.constant 0 : i32
    %c0_i32_1 = arith.constant 0 : i32
    %c0_i32_2 = arith.constant 0 : i32
    return %c0_i32, %c0_i32_0, %c0_i32_1 : i32, i32, i32
  }
  func.func @transform_7(%arg0: i32) -> (i32, i32, i32) {
    %c0_i32 = arith.constant 0 : i32
    %c0_i32_0 = arith.constant 0 : i32
    %c0_i32_1 = arith.constant 0 : i32
    %c0_i32_2 = arith.constant 0 : i32
    return %c0_i32, %c0_i32_0, %c0_i32_1 : i32, i32, i32
  }
  func.func @transform_8(%arg0: i32) -> (i32, i32, i32) {
    %c0_i32 = arith.constant 0 : i32
    %c0_i32_0 = arith.constant 0 : i32
    %c0_i32_1 = arith.constant 0 : i32
    %c0_i32_2 = arith.constant 0 : i32
    return %c0_i32, %c0_i32_0, %c0_i32_1 : i32, i32, i32
  }
  func.func @transform_9(%arg0: i32) -> (i32, i32, i32) {
    %c0_i32 = arith.constant 0 : i32
    %c0_i32_0 = arith.constant 0 : i32
    %c0_i32_1 = arith.constant 0 : i32
    %c0_i32_2 = arith.constant 0 : i32
    return %c0_i32, %c0_i32_0, %c0_i32_1 : i32, i32, i32
  }
  func.func @transform_10(%arg0: i32) -> (i32, i32, i32) {
    %c0_i32 = arith.constant 0 : i32
    %c0_i32_0 = arith.constant 0 : i32
    %c0_i32_1 = arith.constant 0 : i32
    %c0_i32_2 = arith.constant 0 : i32
    return %c0_i32, %c0_i32_0, %c0_i32_1 : i32, i32, i32
  }
  func.func @transform_11(%arg0: i32) -> (i32, i32, i32) {
    %c0_i32 = arith.constant 0 : i32
    %c0_i32_0 = arith.constant 0 : i32
    %c0_i32_1 = arith.constant 0 : i32
    %c0_i32_2 = arith.constant 0 : i32
    return %c0_i32, %c0_i32_0, %c0_i32_1 : i32, i32, i32
  }
  func.func @transform_12(%arg0: i32) -> (i32, i32, i32) {
    %c0_i32 = arith.constant 0 : i32
    %c0_i32_0 = arith.constant 0 : i32
    %c0_i32_1 = arith.constant 0 : i32
    %c0_i32_2 = arith.constant 0 : i32
    return %c0_i32, %c0_i32_0, %c0_i32_1 : i32, i32, i32
  }
  func.func @transform_13(%arg0: i32) -> (i32, i32, i32) {
    %c0_i32 = arith.constant 0 : i32
    %c0_i32_0 = arith.constant 0 : i32
    %c0_i32_1 = arith.constant 0 : i32
    %c0_i32_2 = arith.constant 0 : i32
    return %c0_i32, %c0_i32_0, %c0_i32_1 : i32, i32, i32
  }
  func.func @transform_14(%arg0: i32) -> (i32, i32, i32) {
    %c0_i32 = arith.constant 0 : i32
    %c0_i32_0 = arith.constant 0 : i32
    %c0_i32_1 = arith.constant 0 : i32
    %c0_i32_2 = arith.constant 0 : i32
    return %c0_i32, %c0_i32_0, %c0_i32_1 : i32, i32, i32
  }
  func.func @transform_15(%arg0: i32) -> (i32, i32, i32) {
    %c0_i32 = arith.constant 0 : i32
    %c0_i32_0 = arith.constant 0 : i32
    %c0_i32_1 = arith.constant 0 : i32
    %c0_i32_2 = arith.constant 0 : i32
    return %c0_i32, %c0_i32_0, %c0_i32_1 : i32, i32, i32
  }
  func.func @transform_16(%arg0: i32) -> (i32, i32) {
    %c0_i32 = arith.constant 0 : i32
    %c0_i32_0 = arith.constant 0 : i32
    %c0_i32_1 = arith.constant 0 : i32
    return %c0_i32, %c0_i32_0 : i32, i32
  }
  func.func @transform_17(%arg0: i32) -> (i32, i32) {
    %c0_i32 = arith.constant 0 : i32
    %c0_i32_0 = arith.constant 0 : i32
    %c0_i32_1 = arith.constant 0 : i32
    return %c0_i32, %c0_i32_0 : i32, i32
  }
  func.func @transform_18(%arg0: i32) -> (i32, i32, i32) {
    %c0_i32 = arith.constant 0 : i32
    %c0_i32_0 = arith.constant 0 : i32
    %c0_i32_1 = arith.constant 0 : i32
    return %arg0, %c0_i32, %c0_i32_0 : i32, i32, i32
  }
}

</mosaic_0001>

<bundles_post_ra>
// kernel: _lambda_.1
= control target key start
LH: loop header
LB: loop body
LE: loop exit
PB: predicated region body
PF: predicated region fallthrough
CT: control target
= control target key end

     0   :  { %s4591_s0 = inlined_call_operand.vmem [shape: f32[2,8,128], index: 0, kind: input, shape index: {}]   ;;  %s4592_s1 = inlined_call_operand.vmem [shape: f32[2,1,8], index: 1, kind: input, shape index: {}]   ;;  %s4593_s2 = inlined_call_operand.vmem [shape: f32[1,128], index: 2, kind: input, shape index: {}]   ;;  %s4594_s3 = inlined_call_operand.vmem [shape: f32[1,128], index: 3, kind: input, shape index: {}, may-alias: {3,17}]   ;;  %s4595_s4 = inlined_call_operand.hbm [shape: f32[2,128,384], index: 4, kind: input, shape index: {}]   ;;  %s4596_s5 = inlined_call_operand.vmem [shape: f32[2,1,384], index: 5, kind: input, shape index: {}]   ;;  %s4597_s6 = inlined_call_operand.hbm [shape: f32[2,128,128], index: 6, kind: input, shape index: {}]   ;;  %s4598_s7 = inlined_call_operand.vmem [shape: f32[2,1,128], index: 7, kind: input, shape index: {}, may-alias: {7,9,13,15}]   ;;  %s4599_s8 = inlined_call_operand.vmem [shape: f32[2,1,128], index: 8, kind: input, shape index: {}, may-alias: {8,14}]   ;;  %s4600_s9 = inlined_call_operand.vmem [shape: f32[2,1,128], index: 9, kind: input, shape index: {}, may-alias: {7,9,13,15}]   ;;  %s4601_s10 = inlined_call_operand.hbm [shape: f32[2,128,512], index: 10, kind: input, shape index: {}]   ;;  %s4602_s11 = inlined_call_operand.vmem [shape: f32[2,1,512], index: 11, kind: input, shape index: {}]   ;;  %s4603_s12 = inlined_call_operand.hbm [shape: f32[2,512,128], index: 12, kind: input, shape index: {}]   ;;  %s4604_s13 = inlined_call_operand.vmem [shape: f32[2,1,128], index: 13, kind: input, shape index: {}, may-alias: {7,9,13,15}]   ;;  %s4605_s14 = inlined_call_operand.vmem [shape: f32[2,1,128], index: 14, kind: input, shape index: {}, may-alias: {8,14}]   ;;  %s4606_s15 = inlined_call_operand.vmem [shape: f32[2,1,128], index: 15, kind: input, shape index: {}, may-alias: {7,9,13,15}]   ;;  %s4607_s16 = inlined_call_operand.vmem [shape: f32[128,128], index: 16, kind: input, shape index: {}]   ;;  %s4608_s17 = inlined_call_operand.vmem [shape: f32[1,128], index: 17, kind: input, shape index: {}, may-alias: {3,17}]   ;;  %s4609_s18 = inlined_call_operand.vmem [shape: f32[2,8,128], index: 18, kind: output, shape index: {}]  }
   0x1   :  { %4611 = sst [smem:[#allocation12_spill]] %s4591_s0 }
   0x2   :  { %4612 = sst [smem:[#allocation13_spill]] %s4592_s1 }
   0x3   :  { %4613 = sst [smem:[#allocation14_spill]] %s4593_s2 }
   0x4   :  { %23 = vsyncpa [#allocation3], 0 }
   0x5   :  { %24 = vsyncpa [#allocation5], 0 }
   0x6   :  { %25 = vsyncpa [#allocation8], 0  ;;  %s4137_s27 = smov 0  }
   0x7 LB: > { %s4029_s28 = smov [#allocation4]   ;;  %s4143_s30 = sadd.s32 4294967295, %s4027_s27   ;;  %s4027_s27 = sphi %s4137_s27, %s31_s27  }
   0x8   : > { %s484_s29 = sshll.u32 %s4029_s28, 4  ;;  %p3291_p0 = scmp.ge.s32.totalorder %s4027_s27, 1  ;;  %s485_s29 = int_to_ptr.vmem [resolvable:$true] %s484_s29 }
   0x9   : > { %p450_p1 = scmp.lt.s32.totalorder %s4027_s27, 3  ;;  %p3833_p2 = scmp.eq.s32.totalorder %s4143_s30, 0 }
   0xa   : > { %s4030_s19 = smov [#allocation2]   ;;  %s4031_s21 = smov [#allocation6]  }
   0xb   : > { %p4148_p3 = pnand %p3291_p0, %p450_p1  ;;  %s468_s1 = sshll.u32 %s4030_s19, 4  ;;  %s4154_s1 = int_to_ptr.vmem [resolvable:$true] %s468_s1 }
   0xc   : > { %s4162_s22 = sshll.u32 %s4031_s21, 4  ;;  %s3916_s2 = scalar_lea.vmem %s485_s29, 4096  ;;  %s507_s22 = int_to_ptr.vmem [resolvable:$true] %s4162_s22 }
   0xd   : > { %p3820_p4 = pneg %p4148_p3  ;;  %p3917_p7 = scmp.ne.s32.totalorder %s485_s29, %s3916_s2 }
   0xe   : > { %p3924_p10 = scmp.lt.s32.totalorder %s485_s29, %s485_s29  ;;  %p3925_p11 = scmp.lt.s32.totalorder %s3916_s2, %s3916_s2 }
   0xf   : > { %p4158_p5 = pnand %p3833_p2, %p3820_p4 }
  0x10   : > { %p3926_p12 = por %p3925_p11, %p3924_p10 }
  0x11   : > { %p3907_p6 = pneg %p4158_p5 }
  0x13   : > { %p3919_p8 = pnand %p3917_p7, %p3907_p6 }
  0x15   : > { %p3920_p9 = pneg %p3919_p8 }
  0x17   : > { %p3927_p13 = pnand %p3926_p12, %p3920_p9 }
  0x19   : > { %3930 = shalt.err (!%p3927_p13)
}
  0x1a   : > { %s4610_s23 = smov 128   ;;  %s4033_s24 = smov 8  }
  0x1b   : > { %3826 = dma.hbm_to_vmem [thread:$0]  (!%p4158_p5), %s4597_s6, 4096, %s485_s29, [#allocation5], %s4610_s23, %s4610_s23, %s4033_s24  }
  0x1c   : > { %s3942_s28 = scalar_lea.vmem %s4154_s1, 12288  ;;  %p3950_p7 = scmp.lt.s32.totalorder %s4154_s1, %s4154_s1 }
  0x1d   : > { %p3943_p0 = scmp.ne.s32.totalorder %s4154_s1, %s3942_s28  ;;  %p3951_p8 = scmp.lt.s32.totalorder %s3942_s28, %s3942_s28 }
  0x1f   : > { %p3945_p1 = pnand %p3943_p0, %p3907_p6  ;;  %p3952_p9 = por %p3951_p8, %p3950_p7 }
  0x21   : > { %p3946_p4 = pneg %p3945_p1 }
  0x23   : > { %p3953_p10 = pnand %p3952_p9, %p3946_p4 }
  0x25   : > { %3956 = shalt.err (!%p3953_p10)
}
  0x26   : > { %s4034_s19 = smov 384   ;;  %s4035_s21 = smov 24  }
  0x27   : > { %3823 = dma.hbm_to_vmem [thread:$0]  (!%p4158_p5), %s4595_s4, 12288, %s4154_s1, [#allocation3], %s4034_s19, %s4034_s19, %s4035_s21  }
  0x28   : > { %s3968_s25 = scalar_lea.vmem %s507_s22, 16384  ;;  %p3976_p0 = scmp.lt.s32.totalorder %s507_s22, %s507_s22 }
  0x29   : > { %p3969_p11 = scmp.ne.s32.totalorder %s507_s22, %s3968_s25  ;;  %p3977_p1 = scmp.lt.s32.totalorder %s3968_s25, %s3968_s25 }
  0x2b   : > { %p3971_p12 = pnand %p3969_p11, %p3907_p6  ;;  %p3978_p4 = por %p3977_p1, %p3976_p0 }
  0x2d   : > { %p3972_p13 = pneg %p3971_p12 }
  0x2f   : > { %p3979_p7 = pnand %p3978_p4, %p3972_p13 }
  0x31   : > { %3982 = shalt.err (!%p3979_p7)
}
  0x32   : > { %s4036_s26 = smov 512   ;;  %s4037_s28 = smov 32  }
  0x33   : > { %3829 = dma.hbm_to_vmem [thread:$0]  (!%p4158_p5), %s4601_s10, 16384, %s507_s22, [#allocation5], %s4036_s26, %s4036_s26, %s4037_s28  }
  0x34   : > { %s4038_s1 = smov [#allocation7]  }
  0x35   : > { %s522_s19 = sshll.u32 %s4038_s1, 4  ;;  %s523_s19 = int_to_ptr.vmem [resolvable:$true] %s522_s19 }
  0x36   : > { %s3994_s21 = scalar_lea.vmem %s523_s19, 16384  ;;  %p4002_p11 = scmp.lt.s32.totalorder %s523_s19, %s523_s19 }
  0x37   : > { %p3995_p8 = scmp.ne.s32.totalorder %s523_s19, %s3994_s21  ;;  %p4003_p12 = scmp.lt.s32.totalorder %s3994_s21, %s3994_s21 }
  0x39   : > { %p3997_p9 = pnand %p3995_p8, %p3907_p6  ;;  %p4004_p13 = por %p4003_p12, %p4002_p11 }
  0x3b   : > { %p3998_p10 = pneg %p3997_p9 }
  0x3d   : > { %p4005_p0 = pnand %p4004_p13, %p3998_p10 }
  0x3f   : > { %4008 = shalt.err (!%p4005_p0)
}
  0x40   : > { %s4616_s2 = smov 128   ;;  %566 = sbr.rel (%p4148_p3) target bundleno = 6312 (0x18a8), region = 92 }
  0x41   : > { %3832 = dma.hbm_to_vmem [thread:$0]  (!%p4158_p5), %s4603_s12, 16384, %s523_s19, [#allocation8], %s4616_s2, %s4616_s2, %s4033_s24  }
  0x45   : > { %4014 = dma.done.wait (%p3833_p2), [#allocation3], 12288  }
  0x46   : > { %4016 = vsyncadd (%p3833_p2), [#allocation3], 4294955008 }
  0x47   : > { %4018 = dma.done.wait (%p3833_p2), [#allocation5], 20480  }
  0x48   : > { %4020 = vsyncadd (%p3833_p2), [#allocation5], 4294946816 }
  0x49   : > { %4022 = dma.done.wait (%p3833_p2), [#allocation8], 16384  }
  0x4a   : > { %4024 = vsyncadd (%p3833_p2), [#allocation8], 4294950912  ;;  %p633_p3 = scmp.lt.s32.totalorder %s4143_s30, 1  ;;  %s4617_s25 = sld [smem:[#allocation12_spill]]  ;;  %v722_v1 = vld [vmem:[#allocation2 + $0x170] sm:$0xff]  ;;  %v721_v2 = vld [vmem:[#allocation2 + $0x168] sm:$0xff]  ;;  %v726_v63 = vlaneseq }
  0x4b   : > { %v723_v3 = vld [vmem:[#allocation2 + $0x178] sm:$0xff]  ;;  %741 = vmatprep.subr.mxu0 %v722_v1  ;;  %v4039_v4 = vmov 0.0   ;;  %v718_v6 = vld [vmem:[#allocation2 + $0x150] sm:$0xff]  ;;  %v720_v7 = vld [vmem:[#allocation2 + $0x160] sm:$0xff]  ;;  %vm4040_vm0 = vmmov 0   ;;  %s4618_s1 = sld [smem:[#allocation14_spill]] }
  0x4c   : > { %s4621_s30 = smov (!%p633_p3, %s4143_s30), 1  ;;  %3584 = vmatprep.subr.mxu1 %v4039_v4  ;;  %v719_v5 = vld [vmem:[#allocation2 + $0x158] sm:$0xff]  ;;  %742 = vmatpush1.msra.mxu0 %v721_v2  ;;  %v716_v8 = vld [vmem:[#allocation2 + $0x140] sm:$0xff]  ;;  %v717_v10 = vld [vmem:[#allocation2 + $0x148] sm:$0xff]  ;;  %vm889_vm1 = vcmask 523264   ;;  %s4041_s23 = smov 64  }
  0x4d   : > { %s3302_s0 = sshll.u32 %s4621_s30, 3  ;;  %3585 = vmatpush3.msra.mxu1 %v723_v3  ;;  %743 = vmatprep.subr.mxu0 %v719_v5  ;;  %v715_v9 = vld [vmem:[#allocation2 + $0x138] sm:$0xff]  ;;  %v713_v11 = vld [vmem:[#allocation2 + $0x128] sm:$0xff]  ;;  %v712_v12 = vld [vmem:[#allocation2 + $0x120] sm:$0xff]  ;;  %vm966_vm2 = vcmask 64512  }
  0x4e   : > { %3586 = vmatprep.subr.mxu1 %v4039_v4  ;;  %744 = vmatpush1.msra.mxu0 %v718_v6  ;;  %v714_v13 = vld [vmem:[#allocation2 + $0x130] sm:$0xff]  ;;  %v709_v19 = vld [vmem:[#allocation2 + $0x108] sm:$0xff]  ;;  %v711_v20 = vld [vmem:[#allocation2 + $0x118] sm:$0xff]  ;;  %s643_s24 = scalar_lea.vmem %s4609_s18, %s3302_s0 }
  0x4f   : > { %3587 = vmatpush3.msra.mxu1 %v720_v7  ;;  %745 = vmatprep.subr.mxu0 %v716_v8  ;;  %v710_v18 = vld [vmem:[#allocation2 + $0x110] sm:$0xff]  ;;  %v707_v21 = vld [vmem:[#allocation2 + $0xf8] sm:$0xff]  ;;  %v708_v23 = vld [vmem:[#allocation2 + $0x100] sm:$0xff] }
  0x50   : > { %s636_s26 = scalar_lea.vmem %s4617_s25, %s3302_s0  ;;  %3588 = vmatprep.subr.mxu1 %v4039_v4  ;;  %746 = vmatpush1.msra.mxu0 %v715_v9  ;;  %v706_v22 = vld [vmem:[#allocation2 + $0xf0] sm:$0xff]  ;;  %v704_v24 = vld [vmem:[#allocation2 + $0xe0] sm:$0xff]  ;;  %v703_v25 = vld [vmem:[#allocation2 + $0xd8] sm:$0xff]  ;;  %s4619_s25 = sld [smem:[#allocation13_spill]] }
  0x51   : > { %v647_v0 = vld [vmem:[%s636_s26] sm:$0xff]  ;;  %3589 = vmatpush3.msra.mxu1 %v717_v10  ;;  %747 = vmatprep.subr.mxu0 %v713_v11  ;;  %v705_v26 = vld [vmem:[#allocation2 + $0xe8] sm:$0xff]  ;;  %v702_v29 = vld [vmem:[#allocation2 + $0xd0] sm:$0xff] }
  0x52   : > { %650 = vadd.xlane.f32.xlu0 %v647_v0  ;;  %3590 = vmatprep.subr.mxu1 %v4039_v4  ;;  %v701_v27 = vld [vmem:[#allocation2 + $0xc8] sm:$0xff]  ;;  %v700_v28 = vld [vmem:[#allocation2 + $0xc0] sm:$0xff]  ;;  %v698_v30 = vld [vmem:[#allocation2 + $0xb0] sm:$0xff] }
  0x53   : > { %748 = vmatpush1.msra.mxu0 %v712_v12  ;;  %3591 = vmatpush3.msra.mxu1 %v714_v13  ;;  %v697_v31 = vld [vmem:[#allocation2 + $0xa8] sm:$0xff]  ;;  %v699_v32 = vld [vmem:[#allocation2 + $0xb8] sm:$0xff]  ;;  %v694_v34 = vld [vmem:[#allocation2 + $0x90] sm:$0xff] }
  0x54   : > { %3592 = vmatprep.subr.mxu1 %v4039_v4  ;;  %805 = vmatprep.mubr.f32.mxu0 %v4039_v4  ;;  %v695_v33 = vld [vmem:[#allocation2 + $0x98] sm:$0xff]  ;;  %v696_v35 = vld [vmem:[#allocation2 + $0xa0] sm:$0xff]  ;;  %v693_v38 = vld [vmem:[#allocation2 + $0x88] sm:$0xff] }
  0x55   : > { %749 = vmatprep.subr.mxu0 %v710_v18  ;;  %3593 = vmatpush3.msra.mxu1 %v711_v20  ;;  %v692_v36 = vld [vmem:[#allocation2 + $0x80] sm:$0xff]  ;;  %v691_v37 = vld [vmem:[#allocation2 + $0x78] sm:$0xff]  ;;  %v689_v39 = vld [vmem:[#allocation2 + $0x68] sm:$0xff] }
  0x56   : > { %750 = vmatpush1.msra.mxu0 %v709_v19  ;;  %3594 = vmatprep.subr.mxu1 %v4039_v4  ;;  %v688_v40 = vld [vmem:[#allocation2 + $0x60] sm:$0xff]  ;;  %v690_v41 = vld [vmem:[#allocation2 + $0x70] sm:$0xff]  ;;  %v685_v43 = vld [vmem:[#allocation2 + $0x48] sm:$0xff]  ;;  %s4302_s26 = scalar_lea.vmem %s4619_s25, %s4621_s30 }
  0x57   : > { %751 = vmatprep.subr.mxu0 %v707_v21  ;;  %3595 = vmatpush3.msra.mxu1 %v708_v23  ;;  %v686_v42 = vld [vmem:[#allocation2 + $0x50] sm:$0xff]  ;;  %v687_v44 = vld [vmem:[#allocation2 + $0x58] sm:$0xff]  ;;  %v684_v47 = vld [vmem:[#allocation2 + $0x40] sm:$0xff] }
  0x58   : > { %752 = vmatpush1.msra.mxu0 %v706_v22  ;;  %3596 = vmatprep.subr.mxu1 %v4039_v4  ;;  %v683_v45 = vld [vmem:[#allocation2 + $0x38] sm:$0xff]  ;;  %v682_v46 = vld [vmem:[#allocation2 + $0x30] sm:$0xff]  ;;  %v680_v48 = vld [vmem:[#allocation2 + $0x20] sm:$0xff] }
  0x59   : > { %753 = vmatprep.subr.mxu0 %v704_v24  ;;  %3597 = vmatpush3.msra.mxu1 %v705_v26  ;;  %v679_v49 = vld [vmem:[#allocation2 + $0x18] sm:$0xff]  ;;  %v681_v50 = vld [vmem:[#allocation2 + $0x28] sm:$0xff]  ;;  %v676_v52 = vld [vmem:[#allocation2] sm:$0xff] }
  0x5a   : > { %754 = vmatpush1.msra.mxu0 %v703_v25  ;;  %3598 = vmatprep.subr.mxu1 %v4039_v4  ;;  %v677_v51 = vld [vmem:[#allocation2 + $0x8] sm:$0xff]  ;;  %v678_v53 = vld [vmem:[#allocation2 + $0x10] sm:$0xff]  ;;  %v3304_v58 = vld [vmem:[%s4618_s1] ss:$0 sm:$0xff] }
  0x5b   : > { %755 = vmatprep.subr.mxu0 %v701_v27  ;;  %3599 = vmatpush3.msra.mxu1 %v702_v29  ;;  %v3305_v60 = vld [vmem:[%s4594_s3] ss:$0 sm:$0xff] }
  0x5c   : > { %756 = vmatpush1.msra.mxu0 %v700_v28  ;;  %3600 = vmatprep.subr.mxu1 %v4039_v4  ;;  %v724_v2 = vld [vmem:[%s4596_s5] sm:$0x7] }
  0x5d   : > { %757 = vmatprep.subr.mxu0 %v698_v30  ;;  %3601 = vmatpush3.msra.mxu1 %v699_v32 }
  0x5e   : > { %758 = vmatpush1.msra.mxu0 %v697_v31  ;;  %3602 = vmatprep.subr.mxu1 %v4039_v4 }
  0x5f   : > { %759 = vmatprep.subr.mxu0 %v695_v33  ;;  %3603 = vmatpush3.msra.mxu1 %v696_v35 }
  0x60   : > { %760 = vmatpush1.msra.mxu0 %v694_v34  ;;  %3604 = vmatprep.subr.mxu1 %v4039_v4 }
  0x61   : > { %761 = vmatprep.subr.mxu0 %v692_v36  ;;  %3605 = vmatpush3.msra.mxu1 %v693_v38 }
  0x62   : > { %762 = vmatpush1.msra.mxu0 %v691_v37  ;;  %3606 = vmatprep.subr.mxu1 %v4039_v4 }
  0x63   : > { %763 = vmatprep.subr.mxu0 %v689_v39  ;;  %3607 = vmatpush3.msra.mxu1 %v690_v41 }
  0x64   : > { %764 = vmatpush1.msra.mxu0 %v688_v40  ;;  %3608 = vmatprep.subr.mxu1 %v4039_v4 }
  0x65   : > { %765 = vmatprep.subr.mxu0 %v686_v42  ;;  %3609 = vmatpush3.msra.mxu1 %v687_v44 }
  0x66   : > { %766 = vmatpush1.msra.mxu0 %v685_v43  ;;  %3610 = vmatprep.subr.mxu1 %v4039_v4 }
  0x67   : > { %767 = vmatprep.subr.mxu0 %v683_v45  ;;  %3611 = vmatpush3.msra.mxu1 %v684_v47 }
  0x68   : > { %768 = vmatpush1.msra.mxu0 %v682_v46  ;;  %3612 = vmatprep.subr.mxu1 %v4039_v4 }
  0x69   : > { %769 = vmatprep.subr.mxu0 %v680_v48  ;;  %3613 = vmatpush3.msra.mxu1 %v681_v50  ;;  %v1237_v50 = vld [vmem:[#allocation4 + $0x78] sm:$0xff] }
  0x6a   : > { %770 = vmatpush1.msra.mxu0 %v679_v49  ;;  %3614 = vmatprep.subr.mxu1 %v4039_v4 }
  0x6b   : > { %771 = vmatprep.subr.mxu0 %v677_v51  ;;  %3615 = vmatpush3.msra.mxu1 %v678_v53  ;;  %v1236_v51 = vld [vmem:[#allocation4 + $0x70] sm:$0xff]  ;;  %v1234_v53 = vld [vmem:[#allocation4 + $0x60] sm:$0xff] }
  0x6c   : > { %772 = vmatpush1.msra.mxu0 %v676_v52  ;;  %3616 = vmatprep.mubr.msk.f32.mxu1 %vm4040_vm0, %v4039_v4  ;;  %v1235_v52 = vld [vmem:[#allocation4 + $0x68] sm:$0xff] }
  0x6d   : > { %3619 = vmatprep.subr.mxu1 %v4039_v4  ;;  %3639 = vmatprep.subr.mxu0 %v4039_v4 }
  0xdb   : > { %v651_v14 = vpop.xlane.xlu0 %650 }
  0xdc   : > { %v653_v15 = vmul.f32 0.0078125, %v651_v14 }
  0xde   : > { %v4240_v16 = vsub.f32 %v647_v0, %v653_v15  ;;  %v4274_v0 = vshrl.u32 %v726_v63, 7  ;;  %v1225_v63 = vld [vmem:[#allocation4 + $0x18] sm:$0xff] }
  0xe0   : > { %v655_v17 = vmul.f32 %v4240_v16, %v4240_v16  ;;  %v4277_v1 = vsub.s32 0, %v4274_v0  ;;  %v4283_v3 = vsub.s32 1, %v4274_v0  ;;  %v4287_v6 = vsub.s32 2, %v4274_v0 }
  0xe2   : > { %656 = vadd.xlane.f32.xlu0 %v655_v17  ;;  %v729_v5 = vrot.slane %v724_v2, %v4277_v1  ;;  %v733_v7 = vrot.slane %v724_v2, %v4283_v3  ;;  %v737_v13 = vrot.slane %v724_v2, %v4287_v6  ;;  %v644_v17 = vld [vmem:[%s4302_s26] sm:$0x1]  ;;  %v1224_v2 = vld [vmem:[#allocation4 + $0x10] sm:$0xff] }
  0xe3   : > { %v645_v18 = vsub.f32 1.0, %v644_v17  ;;  %v1404_v17 = vld [vmem:[#allocation6 + $0x1e8] sm:$0xff] }
  0xe5   : > { %v646_v19 = vmul.f32 -10000.0, %v645_v18  ;;  %v1406_v18 = vld [vmem:[#allocation6 + $0x1f8] sm:$0xff] }
  0xe7   : > { %v4306_v20 = vrot.slane %v646_v19, %v4277_v1  ;;  %v1403_v19 = vld [vmem:[#allocation6 + $0x1e0] sm:$0xff] }
 0x16b   : > { %v657_v54 = vpop.xlane.xlu0 %656 }
 0x16c   : > { %v658_v55 = vmul.f32 0.0078125, %v657_v54  ;;  %v1233_v54 = vld [vmem:[#allocation4 + $0x58] sm:$0xff] }
 0x16e   : > { %v659_v56 = vadd.f32 1e-12, %v658_v55  ;;  %v1232_v55 = vld [vmem:[#allocation4 + $0x50] sm:$0xff] }
 0x170   : > { %3862 = vrsqrt.f32 %v659_v56  ;;  %v1231_v56 = vld [vmem:[#allocation4 + $0x48] sm:$0xff] }
 0x17d   : > { %v3863_v57 = vpop.eup %3862 }
 0x17e   : > { %v661_v59 = vmul.f32 %v3863_v57, %v4240_v16  ;;  %v1230_v57 = vld [vmem:[#allocation4 + $0x40] sm:$0xff] }
 0x180   : > { %v668_v61 = vmul.f32 %v3304_v58, %v661_v59  ;;  %v1229_v58 = vld [vmem:[#allocation4 + $0x38] sm:$0xff]  ;;  %v1228_v59 = vld [vmem:[#allocation4 + $0x30] sm:$0xff] }
 0x182   : > { %v4266_v62 = vadd.f32 %v3305_v60, %v668_v61  ;;  %v1227_v60 = vld [vmem:[#allocation4 + $0x28] sm:$0xff]  ;;  %v1226_v61 = vld [vmem:[#allocation4 + $0x20] sm:$0xff] }
 0x184   : > { %806 = vmatmul.mubr.f32.vlgmr.msra.gmra.mxu0 %v4266_v62  ;;  %3617 = vmatmul.mubr.f32.vlgmr.msra.gmra.mxu1 %v4266_v62 }
 0x185   : > { %3621 = vmatprep.mubr.msk.f32.mxu1 %vm4040_vm0, %v4039_v4  ;;  %3671 = vmatprep.mubr.msk.f32.mxu0 %vm4040_vm0, %v4039_v4 }
 0x186   : > { %3640 = vmatpush3.msra.mxu0 %v1237_v50  ;;  %v1378_v50 = vld [vmem:[#allocation6 + $0x118] sm:$0xff] }
 0x187   : > { %3641 = vmatprep.subr.mxu0 %v4039_v4 }
 0x188   : > { %3642 = vmatpush3.msra.mxu0 %v1236_v51  ;;  %v1375_v51 = vld [vmem:[#allocation6 + $0x100] sm:$0xff] }
 0x189   : > { %3643 = vmatprep.subr.mxu0 %v4039_v4 }
 0x18a   : > { %3644 = vmatpush3.msra.mxu0 %v1235_v52  ;;  %v1377_v52 = vld [vmem:[#allocation6 + $0x110] sm:$0xff] }
 0x18b   : > { %3645 = vmatprep.subr.mxu0 %v4039_v4 }
 0x18c   : > { %3646 = vmatpush3.msra.mxu0 %v1234_v53  ;;  %v1372_v53 = vld [vmem:[#allocation6 + $0xe8] sm:$0xff] }
 0x18d   : > { %3647 = vmatprep.subr.mxu0 %v4039_v4 }
 0x18e   : > { %3648 = vmatpush3.msra.mxu0 %v1233_v54  ;;  %v1374_v54 = vld [vmem:[#allocation6 + $0xf8] sm:$0xff] }
 0x18f   : > { %3649 = vmatprep.subr.mxu0 %v4039_v4 }
 0x190   : > { %3650 = vmatpush3.msra.mxu0 %v1232_v55  ;;  %v1371_v55 = vld [vmem:[#allocation6 + $0xe0] sm:$0xff] }
 0x191   : > { %3651 = vmatprep.subr.mxu0 %v4039_v4 }
 0x192   : > { %3652 = vmatpush3.msra.mxu0 %v1231_v56  ;;  %v1373_v56 = vld [vmem:[#allocation6 + $0xf0] sm:$0xff] }
 0x193   : > { %3653 = vmatprep.subr.mxu0 %v4039_v4 }
 0x194   : > { %3654 = vmatpush3.msra.mxu0 %v1230_v57  ;;  %v1368_v57 = vld [vmem:[#allocation6 + $0xc8] sm:$0xff] }
 0x195   : > { %3655 = vmatprep.subr.mxu0 %v4039_v4 }
 0x196   : > { %3656 = vmatpush3.msra.mxu0 %v1229_v58  ;;  %v1370_v58 = vld [vmem:[#allocation6 + $0xd8] sm:$0xff] }
 0x197   : > { %3657 = vmatprep.subr.mxu0 %v4039_v4 }
 0x198   : > { %3658 = vmatpush3.msra.mxu0 %v1228_v59  ;;  %v1367_v59 = vld [vmem:[#allocation6 + $0xc0] sm:$0xff] }
 0x199   : > { %3659 = vmatprep.subr.mxu0 %v4039_v4 }
 0x19a   : > { %3660 = vmatpush3.msra.mxu0 %v1227_v60  ;;  %v1369_v60 = vld [vmem:[#allocation6 + $0xd0] sm:$0xff] }
 0x19b   : > { %3661 = vmatprep.subr.mxu0 %v4039_v4 }
 0x19c   : > { %3662 = vmatpush3.msra.mxu0 %v1226_v61  ;;  %v1364_v61 = vld [vmem:[#allocation6 + $0xa8] sm:$0xff] }
 0x19d   : > { %3663 = vmatprep.subr.mxu0 %v4039_v4 }
 0x19e   : > { %3664 = vmatpush3.msra.mxu0 %v1225_v63  ;;  %v1366_v63 = vld [vmem:[#allocation6 + $0xb8] sm:$0xff] }
 0x19f   : > { %3665 = vmatprep.subr.mxu0 %v4039_v4 }
 0x1a0   : > { %3666 = vmatpush3.msra.mxu0 %v1224_v2  ;;  %v1363_v2 = vld [vmem:[#allocation6 + $0xa0] sm:$0xff] }
 0x1a1   : > { %3667 = vmatprep.subr.mxu0 %v4039_v4 }
 0x244   : > { %v807_v8 = vpop.f32.mrf.mxu0  ;;  %v878_v9 = vpop.f32.mrf.mxu1 }
 0x245   : > { %v808_v10 = vadd.f32 %v807_v8, %v729_v5  ;;  %v879_v16 = vadd.f32 %v878_v9, %v737_v13  ;;  %v1223_v5 = vld [vmem:[#allocation4 + $0x8] sm:$0xff] }
 0x246   : > { %v809_v11 = vpop.f32.mrf.mxu0  ;;  %v3618_v12 = vpop.f32.mrf.mxu1  ;;  %3668 = vmatpush3.msra.mxu0 %v1223_v5  ;;  %v1365_v5 = vld [vmem:[#allocation6 + $0xb0] sm:$0xff] }
 0x247   : > { %v810_v14 = vadd.f32 %v809_v11, %v733_v7  ;;  %v882_v15 = vmul.f32 0.125, %v808_v10  ;;  %3669 = vmatprep.subr.mxu0 %v4039_v4  ;;  %v1222_v7 = vld [vmem:[#allocation4] sm:$0xff] }
 0x248   : > { %3670 = vmatpush3.msra.mxu0 %v1222_v7  ;;  %v3312_v12 = vld [vmem:[%s4598_s7] ss:$0 sm:$0xff]  ;;  %v1360_v7 = vld [vmem:[#allocation6 + $0x88] sm:$0xff] }
 0x249   : > { %1053 = vrot.lane.b32.xlu0 %v810_v14, %s4041_s23  ;;  %3620 = vmatpush3.xpose.msk.msra.mxu1 %vm889_vm1, %v810_v14 }
 0x24a   : > { %3624 = vmatprep.subr.mxu1 %v4039_v4  ;;  %1500 = vmatprep.subr.mxu0 %v1406_v18  ;;  %v1353_v18 = vld [vmem:[#allocation6 + $0x50] sm:$0xff] }
 0x24c   : > { %3622 = vmatmul.mubr.msk.f32.vlgmr.msra.gmra.mxu1 %vm889_vm1, %v882_v15 }
 0x24d   : > { %3625 = vmatpush3.msra.mxu1 %v879_v16  ;;  %3626 = vmatprep.mubr.msk.f32.mxu1 %vm4040_vm0, %v4039_v4 }
 0x24e   : > { %3629 = vmatprep.subr.mxu1 %v4039_v4 }
 0x2bb   : > { %v1054_v33 = vpop.permute.xlu0 %1053 }
 0x30c   : > { %v962_v21 = vpop.f32.mrf.mxu1 }
 0x30d   : > { %v963_v22 = vadd.f32 %v962_v21, %v4306_v20  ;;  %v1405_v21 = vld [vmem:[#allocation6 + $0x1f0] sm:$0xff] }
 0x30e   : > { %v3623_v23 = vpop.f32.mrf.mxu1 }
 0x30f   : > { %v967_v24 = vsel %vm966_vm2, %v963_v22, -inf  ;;  %v1402_v23 = vld [vmem:[#allocation6 + $0x1d8] sm:$0xff] }
 0x310   : > { %968 = vmax.xlane.f32.xlu1 %v967_v24  ;;  %v1399_v24 = vld [vmem:[#allocation6 + $0x1c0] sm:$0xff] }
 0x399   : > { %v969_v25 = vpop.xlane.xlu1 %968 }
 0x39a   : > { %v970_v26 = vsub.f32 %v963_v22, %v969_v25  ;;  %v1400_v22 = vld [vmem:[#allocation6 + $0x1c8] sm:$0xff]  ;;  %v1401_v25 = vld [vmem:[#allocation6 + $0x1d0] sm:$0xff] }
 0x39c   : > { %v971_v27 = vmul.f32 1.442695, %v970_v26  ;;  %v1396_v26 = vld [vmem:[#allocation6 + $0x1a8] sm:$0xff] }
 0x39e   : > { %3864 = vpow2.f32 %v971_v27  ;;  %v1398_v27 = vld [vmem:[#allocation6 + $0x1b8] sm:$0xff] }
 0x3ab   : > { %v3865_v28 = vpop.eup %3864 }
 0x3ac   : > { %v973_v29 = vsel %vm966_vm2, %v3865_v28, 0.0 }
 0x3ad   : > { %974 = vadd.xlane.f32.xlu1 %v973_v29  ;;  %v1397_v29 = vld [vmem:[#allocation6 + $0x1b0] sm:$0xff] }
 0x3be   : > { %1051 = vrot.lane.b32.xlu1 %v882_v15, %s4041_s23 }
 0x436   : > { %v975_v30 = vpop.xlane.xlu1 %974 }
 0x437   : > { %3866 = vrcp.f32 %v975_v30  ;;  %v1394_v30 = vld [vmem:[#allocation6 + $0x198] sm:$0xff] }
 0x43a   : > { %v1052_v34 = vpop.permute.xlu1 %1051 }
 0x444   : > { %v3867_v31 = vpop.eup %3866 }
 0x445   : > { %v977_v32 = vmul.f32 %v3867_v31, %v3865_v28  ;;  %v1395_v28 = vld [vmem:[#allocation6 + $0x1a0] sm:$0xff] }
 0x446   : > { %v1391_v31 = vld [vmem:[#allocation6 + $0x180] sm:$0xff] }
 0x447   : > { %3627 = vmatmul.mubr.msk.f32.vlgmr.msra.gmra.mxu1 %vm966_vm2, %v977_v32  ;;  %v1393_v32 = vld [vmem:[#allocation6 + $0x190] sm:$0xff] }
 0x448   : > { %3630 = vmatpush3.xpose.msk.msra.mxu1 %vm889_vm1, %v1054_v33  ;;  %3631 = vmatprep.mubr.msk.f32.mxu1 %vm4040_vm0, %v4039_v4 }
 0x449   : > { %3634 = vmatprep.subr.mxu1 %v4039_v4 }
 0x44b   : > { %3632 = vmatmul.mubr.msk.f32.vlgmr.msra.gmra.mxu1 %vm889_vm1, %v1052_v34 }
 0x44c   : > { %3636 = vmatprep.mubr.msk.f32.mxu1 %vm4040_vm0, %v4039_v4 }
 0x507   : > { %v4320_v35 = vpop.f32.mrf.mxu1 }
 0x509   : > { %v3628_v36 = vpop.f32.mrf.mxu1 }
 0x50b   : > { %v1125_v37 = vpop.f32.mrf.mxu1 }
 0x50c   : > { %v1126_v38 = vadd.f32 %v1125_v37, %v4306_v20  ;;  %v1388_v37 = vld [vmem:[#allocation6 + $0x168] sm:$0xff] }
 0x50d   : > { %v3633_v39 = vpop.f32.mrf.mxu1 }
 0x50e   : > { %v1129_v40 = vsel %vm966_vm2, %v1126_v38, -inf  ;;  %v1387_v39 = vld [vmem:[#allocation6 + $0x160] sm:$0xff] }
 0x50f   : > { %1130 = vmax.xlane.f32.xlu1 %v1129_v40  ;;  %v1389_v40 = vld [vmem:[#allocation6 + $0x170] sm:$0xff] }
 0x598   : > { %v1131_v41 = vpop.xlane.xlu1 %1130 }
 0x599   : > { %v1132_v42 = vsub.f32 %v1126_v38, %v1131_v41  ;;  %v1390_v38 = vld [vmem:[#allocation6 + $0x178] sm:$0xff]  ;;  %v1384_v41 = vld [vmem:[#allocation6 + $0x148] sm:$0xff] }
 0x59b   : > { %v1133_v43 = vmul.f32 1.442695, %v1132_v42  ;;  %v1386_v42 = vld [vmem:[#allocation6 + $0x158] sm:$0xff] }
 0x59d   : > { %3868 = vpow2.f32 %v1133_v43  ;;  %v1383_v43 = vld [vmem:[#allocation6 + $0x140] sm:$0xff] }
 0x5aa   : > { %v3869_v44 = vpop.eup %3868 }
 0x5ab   : > { %v1135_v45 = vsel %vm966_vm2, %v3869_v44, 0.0 }
 0x5ac   : > { %1136 = vadd.xlane.f32.xlu0 %v1135_v45  ;;  %v1380_v45 = vld [vmem:[#allocation6 + $0x128] sm:$0xff] }
 0x5c2   : > { %1141 = vrot.lane.b32.xlu0 %v879_v16, %s4041_s23 }
 0x635   : > { %v1137_v46 = vpop.xlane.xlu0 %1136 }
 0x636   : > { %3870 = vrcp.f32 %v1137_v46  ;;  %v1382_v46 = vld [vmem:[#allocation6 + $0x138] sm:$0xff] }
 0x639   : > { %v1142_v47 = vpop.permute.xlu0 %1141 }
 0x63a   : > { %3635 = vmatpush3.msra.mxu1 %v1142_v47  ;;  %v1379_v47 = vld [vmem:[#allocation6 + $0x120] sm:$0xff] }
 0x63b   : > { %1429 = vmatprep.subr.mxu1 %v1404_v17  ;;  %v1351_v17 = vld [vmem:[#allocation6 + $0x40] sm:$0xff] }
 0x643   : > { %v3871_v48 = vpop.eup %3870 }
 0x644   : > { %v1139_v49 = vmul.f32 %v3871_v48, %v3869_v44  ;;  %v1385_v44 = vld [vmem:[#allocation6 + $0x150] sm:$0xff] }
 0x645   : > { %v1381_v48 = vld [vmem:[#allocation6 + $0x130] sm:$0xff] }
 0x646   : > { %3637 = vmatmul.mubr.msk.f32.vlgmr.msra.gmra.mxu1 %vm966_vm2, %v1139_v49  ;;  %v1376_v49 = vld [vmem:[#allocation6 + $0x108] sm:$0xff] }
 0x647   : > { %1493 = vmatprep.mubr.f32.mxu1 %v4039_v4  ;;  %1430 = vmatpush1.msra.mxu1 %v1403_v19  ;;  %v1348_v19 = vld [vmem:[#allocation6 + $0x28] sm:$0xff] }
 0x648   : > { %1431 = vmatprep.subr.mxu1 %v1400_v22  ;;  %v1347_v22 = vld [vmem:[#allocation6 + $0x20] sm:$0xff] }
 0x649   : > { %1432 = vmatpush1.msra.mxu1 %v1399_v24  ;;  %v1344_v24 = vld [vmem:[#allocation6 + $0x8] sm:$0xff] }
 0x64a   : > { %1433 = vmatprep.subr.mxu1 %v1396_v26  ;;  %v1343_v26 = vld [vmem:[#allocation6] sm:$0xff] }
 0x64b   : > { %1434 = vmatpush1.msra.mxu1 %v1395_v28 }
 0x706   : > { %v1213_v8 = vpop.f32.mrf.mxu1 }
 0x707   : > { %1218 = vrot.lane.b32.xlu1 %v1213_v8, %s4041_s23  ;;  %v1362_v8 = vld [vmem:[#allocation6 + $0x98] sm:$0xff] }
 0x708   : > { %v3638_v9 = vpop.f32.mrf.mxu1 }
 0x709   : > { %v1359_v9 = vld [vmem:[#allocation6 + $0x80] sm:$0xff] }
 0x779   : > { %v1219_v10 = vpop.permute.xlu1 %1218 }
 0x77a   : > { %v1221_v11 = vsel %vm889_vm1, %v4320_v35, %v1219_v10  ;;  %v1361_v10 = vld [vmem:[#allocation6 + $0x90] sm:$0xff] }
 0x77b   : > { %3672 = vmatmul.mubr.f32.vlgmr.msra.gmra.mxu0 %v1221_v11  ;;  %v1356_v11 = vld [vmem:[#allocation6 + $0x68] sm:$0xff] }
 0x77c   : > { %1564 = vmatprep.mubr.f32.mxu0 %v4039_v4  ;;  %1501 = vmatpush1.msra.mxu0 %v1405_v21  ;;  %v1350_v21 = vld [vmem:[#allocation6 + $0x38] sm:$0xff] }
 0x77d   : > { %1502 = vmatprep.subr.mxu0 %v1402_v23  ;;  %v1349_v23 = vld [vmem:[#allocation6 + $0x30] sm:$0xff] }
 0x77e   : > { %1503 = vmatpush1.msra.mxu0 %v1401_v25  ;;  %v1346_v25 = vld [vmem:[#allocation6 + $0x18] sm:$0xff] }
 0x77f   : > { %1504 = vmatprep.subr.mxu0 %v1398_v27  ;;  %v1345_v27 = vld [vmem:[#allocation6 + $0x10] sm:$0xff] }
 0x780   : > { %1505 = vmatpush1.msra.mxu0 %v1397_v29 }
 0x781   : > { %1506 = vmatprep.subr.mxu0 %v1394_v30 }
 0x782   : > { %1507 = vmatpush1.msra.mxu0 %v1393_v32 }
 0x783   : > { %1508 = vmatprep.subr.mxu0 %v1390_v38  ;;  %v1670_v38 = vld [vmem:[#allocation7 + $0x1f8] sm:$0xff] }
 0x784   : > { %1509 = vmatpush1.msra.mxu0 %v1389_v40  ;;  %v1654_v40 = vld [vmem:[#allocation7 + $0x178] sm:$0xff] }
 0x785   : > { %1510 = vmatprep.subr.mxu0 %v1386_v42  ;;  %v1621_v42 = vld [vmem:[#allocation7 + $0x70] sm:$0xff] }
 0x786   : > { %1511 = vmatpush1.msra.mxu0 %v1385_v44  ;;  %v1636_v44 = vld [vmem:[#allocation7 + $0xe8] sm:$0xff] }
 0x787   : > { %1512 = vmatprep.subr.mxu0 %v1382_v46  ;;  %v1620_v46 = vld [vmem:[#allocation7 + $0x68] sm:$0xff] }
 0x788   : > { %1513 = vmatpush1.msra.mxu0 %v1381_v48  ;;  %v1635_v48 = vld [vmem:[#allocation7 + $0xe0] sm:$0xff] }
 0x789   : > { %1514 = vmatprep.subr.mxu0 %v1378_v50  ;;  %v1619_v50 = vld [vmem:[#allocation7 + $0x60] sm:$0xff] }
 0x78a   : > { %1515 = vmatpush1.msra.mxu0 %v1377_v52  ;;  %v1634_v52 = vld [vmem:[#allocation7 + $0xd8] sm:$0xff] }
 0x78b   : > { %1516 = vmatprep.subr.mxu0 %v1374_v54  ;;  %v1618_v54 = vld [vmem:[#allocation7 + $0x58] sm:$0xff] }
 0x78c   : > { %1517 = vmatpush1.msra.mxu0 %v1373_v56  ;;  %v1633_v56 = vld [vmem:[#allocation7 + $0xd0] sm:$0xff] }
 0x78d   : > { %1518 = vmatprep.subr.mxu0 %v1370_v58  ;;  %v1617_v58 = vld [vmem:[#allocation7 + $0x50] sm:$0xff] }
 0x78e   : > { %1519 = vmatpush1.msra.mxu0 %v1369_v60  ;;  %v1632_v60 = vld [vmem:[#allocation7 + $0xc8] sm:$0xff] }
 0x78f   : > { %1520 = vmatprep.subr.mxu0 %v1366_v63  ;;  %v1616_v63 = vld [vmem:[#allocation7 + $0x48] sm:$0xff] }
 0x790   : > { %1521 = vmatpush1.msra.mxu0 %v1365_v5  ;;  %v1631_v5 = vld [vmem:[#allocation7 + $0xc0] sm:$0xff] }
 0x791   : > { %1522 = vmatprep.subr.mxu0 %v1362_v8  ;;  %v1615_v8 = vld [vmem:[#allocation7 + $0x40] sm:$0xff] }
 0x792   : > { %1523 = vmatpush1.msra.mxu0 %v1361_v10  ;;  %v1630_v10 = vld [vmem:[#allocation7 + $0xb8] sm:$0xff] }
 0x83b   : > { %v1311_v13 = vpop.f32.mrf.mxu0 }
 0x83c   : > { %v1312_v14 = vadd.f32 %v3312_v12, %v1311_v13  ;;  %v1358_v12 = vld [vmem:[#allocation6 + $0x78] sm:$0xff]  ;;  %v1355_v13 = vld [vmem:[#allocation6 + $0x60] sm:$0xff] }
 0x83d   : > { %v3673_v15 = vpop.f32.mrf.mxu0  ;;  %1524 = vmatprep.subr.mxu0 %v1358_v12  ;;  %v1614_v12 = vld [vmem:[#allocation7 + $0x38] sm:$0xff] }
 0x83e   : > { %v1315_v16 = vadd.f32 %v1312_v14, %v4266_v62  ;;  %v1392_v62 = vld [vmem:[#allocation6 + $0x188] sm:$0xff]  ;;  %v1357_v14 = vld [vmem:[#allocation6 + $0x70] sm:$0xff] }
 0x83f   : > { %1435 = vmatprep.subr.mxu1 %v1392_v62  ;;  %v1352_v15 = vld [vmem:[#allocation6 + $0x48] sm:$0xff]  ;;  %1525 = vmatpush1.msra.mxu0 %v1357_v14  ;;  %v1629_v14 = vld [vmem:[#allocation7 + $0xb0] sm:$0xff] }
 0x840   : > { %1318 = vadd.xlane.f32.xlu1 %v1315_v16  ;;  %1436 = vmatpush1.msra.mxu1 %v1391_v31  ;;  %v3313_v31 = vld [vmem:[%s4599_s8] ss:$0 sm:$0xff] }
 0x841   : > { %1437 = vmatprep.subr.mxu1 %v1388_v37  ;;  %v1638_v37 = vld [vmem:[#allocation7 + $0xf8] sm:$0xff] }
 0x842   : > { %1438 = vmatpush1.msra.mxu1 %v1387_v39  ;;  %v1622_v39 = vld [vmem:[#allocation7 + $0x78] sm:$0xff] }
 0x843   : > { %1439 = vmatprep.subr.mxu1 %v1384_v41  ;;  %v1669_v41 = vld [vmem:[#allocation7 + $0x1f0] sm:$0xff] }
 0x844   : > { %1440 = vmatpush1.msra.mxu1 %v1383_v43  ;;  %v1653_v43 = vld [vmem:[#allocation7 + $0x170] sm:$0xff] }
 0x845   : > { %1441 = vmatprep.subr.mxu1 %v1380_v45  ;;  %v1668_v45 = vld [vmem:[#allocation7 + $0x1e8] sm:$0xff] }
 0x846   : > { %1442 = vmatpush1.msra.mxu1 %v1379_v47  ;;  %v1652_v47 = vld [vmem:[#allocation7 + $0x168] sm:$0xff] }
 0x847   : > { %1443 = vmatprep.subr.mxu1 %v1376_v49  ;;  %v1667_v49 = vld [vmem:[#allocation7 + $0x1e0] sm:$0xff] }
 0x848   : > { %1444 = vmatpush1.msra.mxu1 %v1375_v51  ;;  %v1651_v51 = vld [vmem:[#allocation7 + $0x160] sm:$0xff] }
 0x849   : > { %1445 = vmatprep.subr.mxu1 %v1372_v53  ;;  %v1666_v53 = vld [vmem:[#allocation7 + $0x1d8] sm:$0xff] }
 0x84a   : > { %1446 = vmatpush1.msra.mxu1 %v1371_v55  ;;  %v1650_v55 = vld [vmem:[#allocation7 + $0x158] sm:$0xff] }
 0x84b   : > { %1447 = vmatprep.subr.mxu1 %v1368_v57  ;;  %v1665_v57 = vld [vmem:[#allocation7 + $0x1d0] sm:$0xff] }
 0x84c   : > { %1448 = vmatpush1.msra.mxu1 %v1367_v59  ;;  %v1649_v59 = vld [vmem:[#allocation7 + $0x150] sm:$0xff] }
 0x84d   : > { %1449 = vmatprep.subr.mxu1 %v1364_v61  ;;  %v1664_v61 = vld [vmem:[#allocation7 + $0x1c8] sm:$0xff] }
 0x84e   : > { %1450 = vmatpush1.msra.mxu1 %v1363_v2  ;;  %v1648_v2 = vld [vmem:[#allocation7 + $0x148] sm:$0xff] }
 0x84f   : > { %1451 = vmatprep.subr.mxu1 %v1360_v7  ;;  %v1663_v7 = vld [vmem:[#allocation7 + $0x1c0] sm:$0xff] }
 0x850   : > { %1452 = vmatpush1.msra.mxu1 %v1359_v9  ;;  %v1647_v9 = vld [vmem:[#allocation7 + $0x140] sm:$0xff] }
 0x851   : > { %1453 = vmatprep.subr.mxu1 %v1356_v11  ;;  %v1662_v11 = vld [vmem:[#allocation7 + $0x1b8] sm:$0xff] }
 0x852   : > { %1454 = vmatpush1.msra.mxu1 %v1355_v13  ;;  %v1646_v13 = vld [vmem:[#allocation7 + $0x138] sm:$0xff] }
 0x853   : > { %1455 = vmatprep.subr.mxu1 %v1352_v15  ;;  %v1661_v15 = vld [vmem:[#allocation7 + $0x1b0] sm:$0xff] }
 0x854   : > { %1456 = vmatpush1.msra.mxu1 %v1351_v17  ;;  %v1645_v17 = vld [vmem:[#allocation7 + $0x130] sm:$0xff] }
 0x855   : > { %1457 = vmatprep.subr.mxu1 %v1348_v19  ;;  %v1660_v19 = vld [vmem:[#allocation7 + $0x1a8] sm:$0xff] }
 0x856   : > { %1458 = vmatpush1.msra.mxu1 %v1347_v22  ;;  %v1644_v22 = vld [vmem:[#allocation7 + $0x128] sm:$0xff] }
 0x857   : > { %1459 = vmatprep.subr.mxu1 %v1344_v24  ;;  %v1659_v24 = vld [vmem:[#allocation7 + $0x1a0] sm:$0xff] }
 0x858   : > { %1460 = vmatpush1.msra.mxu1 %v1343_v26  ;;  %v1643_v26 = vld [vmem:[#allocation7 + $0x120] sm:$0xff] }
 0x859   : > { %3383 = vmatprep.subr.mxu1 %v1638_v37  ;;  %v1656_v37 = vld [vmem:[#allocation7 + $0x188] sm:$0xff] }
 0x8c9   : > { %v1319_v33 = vpop.xlane.xlu1 %1318 }
 0x8ca   : > { %v1320_v34 = vmul.f32 0.0078125, %v1319_v33  ;;  %v3314_v33 = vld [vmem:[%s4600_s9] ss:$0 sm:$0xff] }
 0x8cc   : > { %v4351_v35 = vsub.f32 %v1315_v16, %v1320_v34  ;;  %v1354_v16 = vld [vmem:[#allocation6 + $0x58] sm:$0xff] }
 0x8cd   : > { %1526 = vmatprep.subr.mxu0 %v1354_v16  ;;  %v1613_v16 = vld [vmem:[#allocation7 + $0x30] sm:$0xff] }
 0x8ce   : > { %v1322_v36 = vmul.f32 %v4351_v35, %v4351_v35  ;;  %1527 = vmatpush1.msra.mxu0 %v1353_v18  ;;  %v1628_v18 = vld [vmem:[#allocation7 + $0xa8] sm:$0xff] }
 0x8cf   : > { %1528 = vmatprep.subr.mxu0 %v1350_v21  ;;  %v1612_v21 = vld [vmem:[#allocation7 + $0x28] sm:$0xff] }
 0x8d0   : > { %1323 = vadd.xlane.f32.xlu0 %v1322_v36  ;;  %1529 = vmatpush1.msra.mxu0 %v1349_v23  ;;  %v1627_v23 = vld [vmem:[#allocation7 + $0xa0] sm:$0xff] }
 0x8d1   : > { %1530 = vmatprep.subr.mxu0 %v1346_v25  ;;  %v1611_v25 = vld [vmem:[#allocation7 + $0x20] sm:$0xff] }
 0x8d2   : > { %1531 = vmatpush1.msra.mxu0 %v1345_v27  ;;  %v1626_v27 = vld [vmem:[#allocation7 + $0x98] sm:$0xff] }
 0x8d3   : > { %3418 = vmatprep.subr.mxu0 %v1670_v38  ;;  %v1608_v38 = vld [vmem:[#allocation7 + $0x8] sm:$0xff] }
 0x959   : > { %v1324_v28 = vpop.xlane.xlu0 %1323 }
 0x95a   : > { %v1325_v29 = vmul.f32 0.0078125, %v1324_v28  ;;  %v1658_v28 = vld [vmem:[#allocation7 + $0x198] sm:$0xff] }
 0x95c   : > { %v1326_v62 = vadd.f32 1e-12, %v1325_v29  ;;  %v1610_v29 = vld [vmem:[#allocation7 + $0x18] sm:$0xff] }
 0x95e   : > { %3872 = vrsqrt.f32 %v1326_v62  ;;  %v1642_v62 = vld [vmem:[#allocation7 + $0x118] sm:$0xff] }
 0x96b   : > { %v3873_v30 = vpop.eup %3872 }
 0x96c   : > { %v1328_v32 = vmul.f32 %v3873_v30, %v4351_v35  ;;  %v1637_v35 = vld [vmem:[#allocation7 + $0xf0] sm:$0xff] }
 0x96d   : > { %v1625_v30 = vld [vmem:[#allocation7 + $0x90] sm:$0xff] }
 0x96e   : > { %v1335_v34 = vmul.f32 %v3313_v31, %v1328_v32  ;;  %v1657_v31 = vld [vmem:[#allocation7 + $0x190] sm:$0xff] }
 0x96f   : > { %v1609_v32 = vld [vmem:[#allocation7 + $0x10] sm:$0xff] }
 0x970   : > { %v4362_v36 = vadd.f32 %v3314_v33, %v1335_v34  ;;  %v1641_v33 = vld [vmem:[#allocation7 + $0x110] sm:$0xff]  ;;  %v1624_v34 = vld [vmem:[#allocation7 + $0x88] sm:$0xff] }
 0x972   : > { %1494 = vmatmul.mubr.f32.vlgmr.msra.gmra.mxu1 %v4362_v36  ;;  %1565 = vmatmul.mubr.f32.vlgmr.msra.gmra.mxu0 %v4362_v36 }
 0x973   : > { %3384 = vmatpush3.msra.mxu1 %v1622_v39  ;;  %3419 = vmatpush3.msra.mxu0 %v1654_v40  ;;  %v1640_v39 = vld [vmem:[#allocation7 + $0x108] sm:$0xff]  ;;  %v1623_v40 = vld [vmem:[#allocation7 + $0x80] sm:$0xff] }
 0x974   : > { %3385 = vmatprep.subr.mxu1 %v1637_v35  ;;  %3420 = vmatprep.subr.mxu0 %v1669_v41  ;;  %v1655_v35 = vld [vmem:[#allocation7 + $0x180] sm:$0xff] }
 0x975   : > { %3386 = vmatpush3.msra.mxu1 %v1621_v42  ;;  %3421 = vmatpush3.msra.mxu0 %v1653_v43  ;;  %v1607_v41 = vld [vmem:[#allocation7] sm:$0xff] }
 0x976   : > { %3387 = vmatprep.subr.mxu1 %v1636_v44  ;;  %3422 = vmatprep.subr.mxu0 %v1668_v45  ;;  %v1639_v42 = vld [vmem:[#allocation7 + $0x100] sm:$0xff]  ;;  %v1423_v44 = vsub.s32 3, %v4274_v0 }
 0x977   : > { %3388 = vmatpush3.msra.mxu1 %v1620_v46  ;;  %3423 = vmatpush3.msra.mxu0 %v1652_v47  ;;  %v1407_v43 = vld [vmem:[%s4602_s11] sm:$0xf] }
 0x978   : > { %3389 = vmatprep.subr.mxu1 %v1635_v48  ;;  %3424 = vmatprep.subr.mxu0 %v1667_v49  ;;  %v1412_v45 = vrot.slane %v1407_v43, %v4277_v1  ;;  %v1420_v46 = vrot.slane %v1407_v43, %v4287_v6  ;;  %v1416_v47 = vrot.slane %v1407_v43, %v4283_v3 }
 0x979   : > { %3390 = vmatpush3.msra.mxu1 %v1619_v50  ;;  %3425 = vmatpush3.msra.mxu0 %v1651_v51  ;;  %v1424_v48 = vrot.slane %v1407_v43, %v1423_v44 }
 0x97a   : > { %3391 = vmatprep.subr.mxu1 %v1634_v52  ;;  %3426 = vmatprep.subr.mxu0 %v1666_v53 }
 0x97b   : > { %3392 = vmatpush3.msra.mxu1 %v1618_v54  ;;  %3427 = vmatpush3.msra.mxu0 %v1650_v55 }
 0x97c   : > { %3393 = vmatprep.subr.mxu1 %v1633_v56  ;;  %3428 = vmatprep.subr.mxu0 %v1665_v57 }
 0x97d   : > { %3394 = vmatpush3.msra.mxu1 %v1617_v58  ;;  %3429 = vmatpush3.msra.mxu0 %v1649_v59 }
 0x97e   : > { %3395 = vmatprep.subr.mxu1 %v1632_v60  ;;  %3430 = vmatprep.subr.mxu0 %v1664_v61 }
 0x97f   : > { %3396 = vmatpush3.msra.mxu1 %v1616_v63  ;;  %3431 = vmatpush3.msra.mxu0 %v1648_v2 }
 0x980   : > { %3397 = vmatprep.subr.mxu1 %v1631_v5  ;;  %3432 = vmatprep.subr.mxu0 %v1663_v7 }
 0x981   : > { %3398 = vmatpush3.msra.mxu1 %v1615_v8  ;;  %3433 = vmatpush3.msra.mxu0 %v1647_v9 }
 0x982   : > { %3399 = vmatprep.subr.mxu1 %v1630_v10  ;;  %3434 = vmatprep.subr.mxu0 %v1662_v11 }
 0x983   : > { %3400 = vmatpush3.msra.mxu1 %v1614_v12  ;;  %3435 = vmatpush3.msra.mxu0 %v1646_v13 }
 0x984   : > { %3401 = vmatprep.subr.mxu1 %v1629_v14  ;;  %3436 = vmatprep.subr.mxu0 %v1661_v15 }
 0x985   : > { %3402 = vmatpush3.msra.mxu1 %v1613_v16  ;;  %3437 = vmatpush3.msra.mxu0 %v1645_v17 }
 0x986   : > { %3403 = vmatprep.subr.mxu1 %v1628_v18  ;;  %3438 = vmatprep.subr.mxu0 %v1660_v19 }
 0x987   : > { %3404 = vmatpush3.msra.mxu1 %v1612_v21  ;;  %3439 = vmatpush3.msra.mxu0 %v1644_v22 }
 0x988   : > { %3405 = vmatprep.subr.mxu1 %v1627_v23  ;;  %3440 = vmatprep.subr.mxu0 %v1659_v24 }
 0x989   : > { %3406 = vmatpush3.msra.mxu1 %v1611_v25  ;;  %3441 = vmatpush3.msra.mxu0 %v1643_v26 }
 0x98a   : > { %3407 = vmatprep.subr.mxu1 %v1626_v27  ;;  %3442 = vmatprep.subr.mxu0 %v1658_v28 }
 0x98b   : > { %3408 = vmatpush3.msra.mxu1 %v1610_v29  ;;  %3443 = vmatpush3.msra.mxu0 %v1642_v62 }
 0x98c   : > { %3409 = vmatprep.subr.mxu1 %v1625_v30  ;;  %3444 = vmatprep.subr.mxu0 %v1657_v31 }
 0x98d   : > { %3410 = vmatpush3.msra.mxu1 %v1609_v32  ;;  %3445 = vmatpush3.msra.mxu0 %v1641_v33 }
 0x98e   : > { %3411 = vmatprep.subr.mxu1 %v1624_v34  ;;  %3446 = vmatprep.subr.mxu0 %v1656_v37 }
 0x98f   : > { %3412 = vmatpush3.msra.mxu1 %v1608_v38  ;;  %3447 = vmatpush3.msra.mxu0 %v1640_v39  ;;  %v3315_v39 = vld [vmem:[%s4604_s13] ss:$0 sm:$0xff] }
 0x990   : > { %3413 = vmatprep.subr.mxu1 %v1623_v40  ;;  %3448 = vmatprep.subr.mxu0 %v1655_v35 }
 0x991   : > { %3414 = vmatpush3.msra.mxu1 %v1607_v41  ;;  %3449 = vmatpush3.msra.mxu0 %v1639_v42 }
 0x992   : > { %3674 = vmatprep.subr.mxu0 %v4039_v4 }
 0xa32   : > { %v1495_v49 = vpop.f32.mrf.mxu1  ;;  %v1566_v50 = vpop.f32.mrf.mxu0 }
 0xa33   : > { %v1496_v51 = vadd.f32 %v1495_v49, %v1412_v45  ;;  %v1567_v52 = vadd.f32 %v1566_v50, %v1420_v46  ;;  %v1894_v49 = vld [vmem:[#allocation2 + $0x2f8] sm:$0xff] }
 0xa34   : > { %v1497_v53 = vpop.f32.mrf.mxu1  ;;  %v1568_v54 = vpop.f32.mrf.mxu0  ;;  %v1890_v50 = vld [vmem:[#allocation2 + $0x2d8] sm:$0xff] }
 0xa35   : > { %v1575_v55 = vmul.f32 0.044715, %v1496_v51  ;;  %v1577_v56 = vmul.f32 0.044715, %v1567_v52  ;;  %v1498_v57 = vadd.f32 %v1497_v53, %v1416_v47  ;;  %v1569_v58 = vadd.f32 %v1568_v54, %v1424_v48  ;;  %v1893_v47 = vld [vmem:[#allocation2 + $0x2f0] sm:$0xff]  ;;  %v1892_v48 = vld [vmem:[#allocation2 + $0x2e8] sm:$0xff] }
 0xa36   : > { %v1571_v62 = vmul.f32 0.5, %v1496_v51  ;;  %v1573_v31 = vmul.f32 0.5, %v1567_v52  ;;  %1913 = vmatprep.subr.mxu1 %v1893_v47  ;;  %v1887_v53 = vld [vmem:[#allocation2 + $0x2c0] sm:$0xff]  ;;  %v1888_v54 = vld [vmem:[#allocation2 + $0x2c8] sm:$0xff] }
 0xa37   : > { %v1579_v59 = vmul.f32 %v1575_v55, %v1496_v51  ;;  %v1581_v60 = vmul.f32 %v1577_v56, %v1567_v52  ;;  %v1576_v61 = vmul.f32 0.044715, %v1498_v57  ;;  %v1578_v63 = vmul.f32 0.044715, %v1569_v58  ;;  %v1886_v55 = vld [vmem:[#allocation2 + $0x2b8] sm:$0xff]  ;;  %v1885_v56 = vld [vmem:[#allocation2 + $0x2b0] sm:$0xff] }
 0xa38   : > { %v1572_v25 = vmul.f32 0.5, %v1498_v57  ;;  %v1574_v28 = vmul.f32 0.5, %v1569_v58 }
 0xa39   : > { %v1583_v2 = vmul.f32 %v1579_v59, %v1496_v51  ;;  %v1585_v5 = vmul.f32 %v1581_v60, %v1567_v52  ;;  %v1580_v7 = vmul.f32 %v1576_v61, %v1498_v57  ;;  %v1582_v8 = vmul.f32 %v1578_v63, %v1569_v58  ;;  %v1881_v63 = vld [vmem:[#allocation2 + $0x290] sm:$0xff] }
 0xa3b   : > { %v1587_v9 = vadd.f32 %v1583_v2, %v1496_v51  ;;  %v1589_v10 = vadd.f32 %v1585_v5, %v1567_v52  ;;  %v1584_v11 = vmul.f32 %v1580_v7, %v1498_v57  ;;  %v1586_v12 = vmul.f32 %v1582_v8, %v1569_v58  ;;  %v1889_v51 = vld [vmem:[#allocation2 + $0x2d0] sm:$0xff]  ;;  %v1891_v52 = vld [vmem:[#allocation2 + $0x2e0] sm:$0xff]  ;;  %v1880_v2 = vld [vmem:[#allocation2 + $0x288] sm:$0xff] }
 0xa3c   : > { %v1882_v5 = vld [vmem:[#allocation2 + $0x298] sm:$0xff]  ;;  %v1877_v8 = vld [vmem:[#allocation2 + $0x270] sm:$0xff] }
 0xa3d   : > { %v1588_v13 = vadd.f32 %v1584_v11, %v1498_v57  ;;  %v1590_v14 = vadd.f32 %v1586_v12, %v1569_v58  ;;  %v1591_v15 = vmul.f32 0.7978846, %v1587_v9  ;;  %v1593_v16 = vmul.f32 0.7978846, %v1589_v10  ;;  %v1883_v57 = vld [vmem:[#allocation2 + $0x2a0] sm:$0xff]  ;;  %v1878_v7 = vld [vmem:[#allocation2 + $0x278] sm:$0xff] }
 0xa3e   : > { %v1879_v9 = vld [vmem:[#allocation2 + $0x280] sm:$0xff]  ;;  %v1874_v11 = vld [vmem:[#allocation2 + $0x258] sm:$0xff]  ;;  %v1876_v12 = vld [vmem:[#allocation2 + $0x268] sm:$0xff] }
 0xa3f   : > { %v1592_v17 = vmul.f32 0.7978846, %v1588_v13  ;;  %v1594_v18 = vmul.f32 0.7978846, %v1590_v14  ;;  %3874 = vtanh.f32 %v1591_v15  ;;  %v1875_v10 = vld [vmem:[#allocation2 + $0x260] sm:$0xff]  ;;  %v1872_v13 = vld [vmem:[#allocation2 + $0x248] sm:$0xff] }
 0xa40   : > { %3876 = vtanh.f32 %v1593_v16  ;;  %v1871_v14 = vld [vmem:[#allocation2 + $0x240] sm:$0xff]  ;;  %v1873_v15 = vld [vmem:[#allocation2 + $0x250] sm:$0xff] }
 0xa41   : > { %3878 = vtanh.f32 %v1592_v17  ;;  %v1869_v16 = vld [vmem:[#allocation2 + $0x230] sm:$0xff]  ;;  %v1868_v17 = vld [vmem:[#allocation2 + $0x228] sm:$0xff] }
 0xa42   : > { %3880 = vtanh.f32 %v1594_v18  ;;  %v1870_v18 = vld [vmem:[#allocation2 + $0x238] sm:$0xff] }
 0xa4c   : > { %v3875_v19 = vpop.eup %3874 }
 0xa4d   : > { %v3877_v21 = vpop.eup %3876  ;;  %v1599_v23 = vadd.f32 1.0, %v3875_v19  ;;  %v1866_v19 = vld [vmem:[#allocation2 + $0x218] sm:$0xff] }
 0xa4e   : > { %v3879_v22 = vpop.eup %3878  ;;  %v1601_v27 = vadd.f32 1.0, %v3877_v21  ;;  %v1865_v21 = vld [vmem:[#allocation2 + $0x210] sm:$0xff] }
 0xa4f   : > { %v3881_v24 = vpop.eup %3880  ;;  %v1600_v26 = vadd.f32 1.0, %v3879_v22  ;;  %v1603_v33 = vmul.f32 %v1599_v23, %v1571_v62  ;;  %v1867_v22 = vld [vmem:[#allocation2 + $0x220] sm:$0xff]  ;;  %v1856_v62 = vld [vmem:[#allocation2 + $0x1c8] sm:$0xff] }
 0xa50   : > { %v1602_v29 = vadd.f32 1.0, %v3881_v24  ;;  %v1605_v34 = vmul.f32 %v1601_v27, %v1573_v31  ;;  %v1863_v23 = vld [vmem:[#allocation2 + $0x200] sm:$0xff]  ;;  %v1862_v24 = vld [vmem:[#allocation2 + $0x1f8] sm:$0xff] }
 0xa51   : > { %v1604_v30 = vmul.f32 %v1600_v26, %v1572_v25  ;;  %v1864_v25 = vld [vmem:[#allocation2 + $0x208] sm:$0xff]  ;;  %v1859_v27 = vld [vmem:[#allocation2 + $0x1e0] sm:$0xff]  ;;  %v1854_v31 = vld [vmem:[#allocation2 + $0x1b8] sm:$0xff] }
 0xa52   : > { %v1606_v32 = vmul.f32 %v1602_v29, %v1574_v28  ;;  %v1860_v26 = vld [vmem:[#allocation2 + $0x1e8] sm:$0xff]  ;;  %v1861_v28 = vld [vmem:[#allocation2 + $0x1f0] sm:$0xff] }
 0xa53   : > { %1742 = vmatprep.mubr.f32.mxu1 %v1604_v30  ;;  %v1857_v29 = vld [vmem:[#allocation2 + $0x1d0] sm:$0xff]  ;;  %v1858_v30 = vld [vmem:[#allocation2 + $0x1d8] sm:$0xff] }
 0xa54   : > { %1812 = vmatprep.mubr.f32.mxu0 %v1606_v32  ;;  %1743 = vmatmul.mubr.f32.vlgmr.msra.gmra.mxu1 %v1603_v33  ;;  %v1853_v32 = vld [vmem:[#allocation2 + $0x1b0] sm:$0xff]  ;;  %v1855_v33 = vld [vmem:[#allocation2 + $0x1c0] sm:$0xff] }
 0xa55   : > { %1813 = vmatmul.mubr.f32.vlgmr.msra.gmra.mxu0 %v1605_v34  ;;  %1977 = vmatprep.mubr.f32.mxu1 %v4039_v4  ;;  %v1851_v34 = vld [vmem:[#allocation2 + $0x1a0] sm:$0xff] }
 0xa56   : > { %3706 = vmatprep.mubr.msk.f32.mxu0 %vm4040_vm0, %v4039_v4  ;;  %3675 = vmatpush3.msra.mxu0 %v1894_v49 }
 0xa57   : > { %1914 = vmatpush1.msra.mxu1 %v1892_v48  ;;  %3676 = vmatprep.subr.mxu0 %v4039_v4  ;;  %v3317_v48 = vld [vmem:[%s4606_s15] ss:$0 sm:$0xff] }
 0xa58   : > { %1915 = vmatprep.subr.mxu1 %v1890_v50  ;;  %3677 = vmatpush3.msra.mxu0 %v1891_v52 }
 0xa59   : > { %1916 = vmatpush1.msra.mxu1 %v1889_v51  ;;  %3678 = vmatprep.subr.mxu0 %v4039_v4  ;;  %v3318_v51 = vld [vmem:[%s4596_s5 + $0x3] sm:$0x7] }
 0xa5a   : > { %1917 = vmatprep.subr.mxu1 %v1887_v53  ;;  %3679 = vmatpush3.msra.mxu0 %v1888_v54  ;;  %v1901_v52 = vrot.slane %v3318_v51, %v4277_v1  ;;  %v1905_v53 = vrot.slane %v3318_v51, %v4283_v3 }
 0xa5b   : > { %1918 = vmatpush1.msra.mxu1 %v1886_v55  ;;  %3680 = vmatprep.subr.mxu0 %v4039_v4 }
 0xa5c   : > { %3681 = vmatpush3.msra.mxu0 %v1885_v56 }
 0xa5d   : > { %3682 = vmatprep.subr.mxu0 %v4039_v4 }
 0xa5e   : > { %3683 = vmatpush3.msra.mxu0 %v1882_v5 }
 0xa5f   : > { %3684 = vmatprep.subr.mxu0 %v4039_v4 }
 0xa60   : > { %3685 = vmatpush3.msra.mxu0 %v1879_v9 }
 0xa61   : > { %3686 = vmatprep.subr.mxu0 %v4039_v4 }
 0xa62   : > { %3687 = vmatpush3.msra.mxu0 %v1876_v12 }
 0xa63   : > { %3688 = vmatprep.subr.mxu0 %v4039_v4 }
 0xa64   : > { %3689 = vmatpush3.msra.mxu0 %v1873_v15 }
 0xa65   : > { %3690 = vmatprep.subr.mxu0 %v4039_v4 }
 0xa66   : > { %3691 = vmatpush3.msra.mxu0 %v1870_v18 }
 0xa67   : > { %3692 = vmatprep.subr.mxu0 %v4039_v4 }
 0xa68   : > { %3693 = vmatpush3.msra.mxu0 %v1867_v22 }
 0xa69   : > { %3694 = vmatprep.subr.mxu0 %v4039_v4 }
 0xa6a   : > { %3695 = vmatpush3.msra.mxu0 %v1864_v25 }
 0xa6b   : > { %3696 = vmatprep.subr.mxu0 %v4039_v4 }
 0xa6c   : > { %3697 = vmatpush3.msra.mxu0 %v1861_v28 }
 0xa6d   : > { %3698 = vmatprep.subr.mxu0 %v4039_v4 }
 0xa6e   : > { %3699 = vmatpush3.msra.mxu0 %v1858_v30 }
 0xa6f   : > { %3700 = vmatprep.subr.mxu0 %v4039_v4 }
 0xa70   : > { %3701 = vmatpush3.msra.mxu0 %v1855_v33  ;;  %v2401_v33 = vld [vmem:[#allocation4 + $0xf0] sm:$0xff] }
 0xa71   : > { %3702 = vmatprep.subr.mxu0 %v4039_v4 }
 0xb14   : > { %v3415_v37 = vpop.f32.mrf.mxu1 }
 0xb15   : > { %v3450_v38 = vpop.f32.mrf.mxu0 }
 0xb16   : > { %v3416_v40 = vpop.f32.mrf.mxu1 }
 0xb17   : > { %v3417_v35 = vadd.f32 %v3416_v40, %v3415_v37  ;;  %v3451_v41 = vpop.f32.mrf.mxu0  ;;  %v1850_v37 = vld [vmem:[#allocation2 + $0x198] sm:$0xff]  ;;  %v1847_v40 = vld [vmem:[#allocation2 + $0x180] sm:$0xff] }
 0xb18   : > { %v3452_v43 = vadd.f32 %v3451_v41, %v3450_v38  ;;  %v1852_v38 = vld [vmem:[#allocation2 + $0x1a8] sm:$0xff] }
 0xb19   : > { %v1745_v42 = vadd.f32 %v3417_v35, %v3315_v39  ;;  %v1848_v39 = vld [vmem:[#allocation2 + $0x188] sm:$0xff]  ;;  %v1849_v35 = vld [vmem:[#allocation2 + $0x190] sm:$0xff]  ;;  %3703 = vmatpush3.msra.mxu0 %v1852_v38  ;;  %v2398_v38 = vld [vmem:[#allocation4 + $0xd8] sm:$0xff] }
 0xb1a   : > { %3704 = vmatprep.subr.mxu0 %v4039_v4 }
 0xb1b   : > { %v1815_v45 = vadd.f32 %v3452_v43, %v1745_v42  ;;  %3705 = vmatpush3.msra.mxu0 %v1849_v35  ;;  %v2395_v35 = vld [vmem:[#allocation4 + $0xc0] sm:$0xff] }
 0xb1d   : > { %v1818_v46 = vadd.f32 %v1815_v45, %v4362_v36  ;;  %v1884_v36 = vld [vmem:[#allocation2 + $0x2a8] sm:$0xff] }
 0xb1e   : > { %1919 = vmatprep.subr.mxu1 %v1884_v36 }
 0xb1f   : > { %1821 = vadd.xlane.f32.xlu0 %v1818_v46  ;;  %1920 = vmatpush1.msra.mxu1 %v1883_v57 }
 0xb20   : > { %1921 = vmatprep.subr.mxu1 %v1881_v63 }
 0xb21   : > { %1922 = vmatpush1.msra.mxu1 %v1880_v2 }
 0xb22   : > { %1923 = vmatprep.subr.mxu1 %v1878_v7 }
 0xb23   : > { %1924 = vmatpush1.msra.mxu1 %v1877_v8 }
 0xb24   : > { %1925 = vmatprep.subr.mxu1 %v1875_v10 }
 0xb25   : > { %1926 = vmatpush1.msra.mxu1 %v1874_v11 }
 0xb26   : > { %1927 = vmatprep.subr.mxu1 %v1872_v13 }
 0xb27   : > { %1928 = vmatpush1.msra.mxu1 %v1871_v14 }
 0xb28   : > { %1929 = vmatprep.subr.mxu1 %v1869_v16 }
 0xb29   : > { %1930 = vmatpush1.msra.mxu1 %v1868_v17 }
 0xb2a   : > { %1931 = vmatprep.subr.mxu1 %v1866_v19 }
 0xb2b   : > { %1932 = vmatpush1.msra.mxu1 %v1865_v21 }
 0xb2c   : > { %1933 = vmatprep.subr.mxu1 %v1863_v23 }
 0xb2d   : > { %1934 = vmatpush1.msra.mxu1 %v1862_v24 }
 0xb2e   : > { %1935 = vmatprep.subr.mxu1 %v1860_v26 }
 0xb2f   : > { %1936 = vmatpush1.msra.mxu1 %v1859_v27 }
 0xb30   : > { %1937 = vmatprep.subr.mxu1 %v1857_v29 }
 0xb31   : > { %1938 = vmatpush1.msra.mxu1 %v1856_v62 }
 0xb32   : > { %1939 = vmatprep.subr.mxu1 %v1854_v31 }
 0xb33   : > { %1940 = vmatpush1.msra.mxu1 %v1853_v32  ;;  %v2402_v32 = vld [vmem:[#allocation4 + $0xf8] sm:$0xff] }
 0xb34   : > { %1941 = vmatprep.subr.mxu1 %v1851_v34  ;;  %v2400_v34 = vld [vmem:[#allocation4 + $0xe8] sm:$0xff] }
 0xb35   : > { %1942 = vmatpush1.msra.mxu1 %v1850_v37  ;;  %v2399_v37 = vld [vmem:[#allocation4 + $0xe0] sm:$0xff] }
 0xb36   : > { %1943 = vmatprep.subr.mxu1 %v1848_v39  ;;  %v2397_v39 = vld [vmem:[#allocation4 + $0xd0] sm:$0xff] }
 0xb37   : > { %1944 = vmatpush1.msra.mxu1 %v1847_v40  ;;  %v2396_v40 = vld [vmem:[#allocation4 + $0xc8] sm:$0xff] }
 0xb38   : > { %3709 = vmatprep.subr.mxu1 %v4039_v4 }
 0xba8   : > { %v1822_v58 = vpop.xlane.xlu0 %1821 }
 0xba9   : > { %v1823_v59 = vmul.f32 0.0078125, %v1822_v58  ;;  %v1909_v58 = vrot.slane %v3318_v51, %v4287_v6 }
 0xbab   : > { %v4387_v60 = vsub.f32 %v1818_v46, %v1823_v59  ;;  %v3316_v46 = vld [vmem:[%s4605_s14] ss:$0 sm:$0xff] }
 0xbad   : > { %v1825_v61 = vmul.f32 %v4387_v60, %v4387_v60 }
 0xbaf   : > { %1826 = vadd.xlane.f32.xlu1 %v1825_v61 }
 0xc38   : > { %v1827_v41 = vpop.xlane.xlu1 %1826 }
 0xc39   : > { %v1828_v42 = vmul.f32 0.0078125, %v1827_v41  ;;  %v2394_v41 = vld [vmem:[#allocation4 + $0xb8] sm:$0xff] }
 0xc3b   : > { %v1829_v43 = vadd.f32 1e-12, %v1828_v42  ;;  %v2393_v42 = vld [vmem:[#allocation4 + $0xb0] sm:$0xff] }
 0xc3d   : > { %3882 = vrsqrt.f32 %v1829_v43  ;;  %v2392_v43 = vld [vmem:[#allocation4 + $0xa8] sm:$0xff] }
 0xc4a   : > { %v3883_v45 = vpop.eup %3882 }
 0xc4b   : > { %v1831_v47 = vmul.f32 %v3883_v45, %v4387_v60  ;;  %v2391_v45 = vld [vmem:[#allocation4 + $0xa0] sm:$0xff] }
 0xc4d   : > { %v1838_v49 = vmul.f32 %v3316_v46, %v1831_v47  ;;  %v2390_v46 = vld [vmem:[#allocation4 + $0x98] sm:$0xff]  ;;  %v2389_v47 = vld [vmem:[#allocation4 + $0x90] sm:$0xff] }
 0xc4f   : > { %v4410_v50 = vadd.f32 %v3317_v48, %v1838_v49  ;;  %v2388_v48 = vld [vmem:[#allocation4 + $0x88] sm:$0xff]  ;;  %v2387_v49 = vld [vmem:[#allocation4 + $0x80] sm:$0xff] }
 0xc51   : > { %1978 = vmatmul.mubr.f32.vlgmr.msra.gmra.mxu1 %v4410_v50  ;;  %3707 = vmatmul.mubr.f32.vlgmr.msra.gmra.mxu0 %v4410_v50 }
 0xc52   : > { %3711 = vmatprep.mubr.msk.f32.mxu1 %vm4040_vm0, %v4039_v4  ;;  %2663 = vmatprep.mubr.f32.mxu0 %v4039_v4 }
 0xd11   : > { %v1979_v54 = vpop.f32.mrf.mxu1  ;;  %v2050_v55 = vpop.f32.mrf.mxu0 }
 0xd12   : > { %v1980_v36 = vadd.f32 %v1979_v54, %v1901_v52  ;;  %v2051_v61 = vadd.f32 %v2050_v55, %v1909_v58  ;;  %v3326_v55 = vld [vmem:[%s4598_s7 + $0x1] ss:$0 sm:$0xff] }
 0xd13   : > { %v1981_v56 = vpop.f32.mrf.mxu1  ;;  %v3708_v57 = vpop.f32.mrf.mxu0 }
 0xd14   : > { %v1982_v59 = vadd.f32 %v1981_v56, %v1905_v53  ;;  %v2054_v60 = vmul.f32 0.125, %v1980_v36 }
 0xd16   : > { %3710 = vmatpush3.xpose.msk.msra.mxu1 %vm889_vm1, %v1982_v59 }
 0xd17   : > { %3714 = vmatprep.subr.mxu1 %v4039_v4 }
 0xd19   : > { %3712 = vmatmul.mubr.msk.f32.vlgmr.msra.gmra.mxu1 %vm889_vm1, %v2054_v60 }
 0xd1a   : > { %3715 = vmatpush3.msra.mxu1 %v2051_v61  ;;  %3716 = vmatprep.mubr.msk.f32.mxu1 %vm4040_vm0, %v4039_v4 }
 0xd1b   : > { %3719 = vmatprep.subr.mxu1 %v4039_v4 }
 0xdd9   : > { %v2127_v63 = vpop.f32.mrf.mxu1 }
 0xdda   : > { %v2128_v2 = vadd.f32 %v2127_v63, %v4306_v20  ;;  %v2574_v63 = vld [vmem:[#allocation6 + $0x3f0] sm:$0xff] }
 0xddb   : > { %v3713_v5 = vpop.f32.mrf.mxu1 }
 0xddc   : > { %v2131_v7 = vsel %vm966_vm2, %v2128_v2, -inf  ;;  %v2571_v5 = vld [vmem:[#allocation6 + $0x3d8] sm:$0xff] }
 0xddd   : > { %2132 = vmax.xlane.f32.xlu0 %v2131_v7  ;;  %v2568_v7 = vld [vmem:[#allocation6 + $0x3c0] sm:$0xff] }
 0xdf3   : > { %2217 = vrot.lane.b32.xlu0 %v1982_v59, %s4041_s23  ;;  %v2573_v59 = vld [vmem:[#allocation6 + $0x3e8] sm:$0xff] }
 0xdf4   : > { %2599 = vmatprep.subr.mxu0 %v2573_v59  ;;  %v2520_v59 = vld [vmem:[#allocation6 + $0x240] sm:$0xff] }
 0xe66   : > { %v2133_v8 = vpop.xlane.xlu0 %2132 }
 0xe67   : > { %v2134_v9 = vsub.f32 %v2128_v2, %v2133_v8  ;;  %v2569_v2 = vld [vmem:[#allocation6 + $0x3c8] sm:$0xff]  ;;  %v2570_v8 = vld [vmem:[#allocation6 + $0x3d0] sm:$0xff] }
 0xe69   : > { %v2135_v10 = vmul.f32 1.442695, %v2134_v9  ;;  %v2565_v9 = vld [vmem:[#allocation6 + $0x3a8] sm:$0xff] }
 0xe6a   : > { %v2218_v16 = vpop.permute.xlu0 %2217 }
 0xe6b   : > { %3884 = vpow2.f32 %v2135_v10  ;;  %v2567_v10 = vld [vmem:[#allocation6 + $0x3b8] sm:$0xff] }
 0xe78   : > { %v3885_v11 = vpop.eup %3884 }
 0xe79   : > { %v2137_v12 = vsel %vm966_vm2, %v3885_v11, 0.0 }
 0xe7a   : > { %2138 = vadd.xlane.f32.xlu1 %v2137_v12  ;;  %v2566_v12 = vld [vmem:[#allocation6 + $0x3b0] sm:$0xff] }
 0xe8b   : > { %2215 = vrot.lane.b32.xlu1 %v2054_v60, %s4041_s23  ;;  %v2575_v60 = vld [vmem:[#allocation6 + $0x3f8] sm:$0xff] }
 0xf03   : > { %v2139_v13 = vpop.xlane.xlu1 %2138 }
 0xf04   : > { %3886 = vrcp.f32 %v2139_v13  ;;  %v2563_v13 = vld [vmem:[#allocation6 + $0x398] sm:$0xff] }
 0xf07   : > { %v2216_v17 = vpop.permute.xlu1 %2215 }
 0xf11   : > { %v3887_v14 = vpop.eup %3886 }
 0xf12   : > { %v2141_v15 = vmul.f32 %v3887_v14, %v3885_v11  ;;  %v2564_v11 = vld [vmem:[#allocation6 + $0x3a0] sm:$0xff] }
 0xf13   : > { %v2560_v14 = vld [vmem:[#allocation6 + $0x380] sm:$0xff] }
 0xf14   : > { %3717 = vmatmul.mubr.msk.f32.vlgmr.msra.gmra.mxu1 %vm966_vm2, %v2141_v15  ;;  %v2562_v15 = vld [vmem:[#allocation6 + $0x390] sm:$0xff] }
 0xf15   : > { %3720 = vmatpush3.xpose.msk.msra.mxu1 %vm889_vm1, %v2218_v16  ;;  %3721 = vmatprep.mubr.msk.f32.mxu1 %vm4040_vm0, %v4039_v4 }
 0xf16   : > { %3724 = vmatprep.subr.mxu1 %v4039_v4 }
 0xf18   : > { %3722 = vmatmul.mubr.msk.f32.vlgmr.msra.gmra.mxu1 %vm889_vm1, %v2216_v17 }
 0xf19   : > { %3726 = vmatprep.mubr.msk.f32.mxu1 %vm4040_vm0, %v4039_v4 }
 0xfd4   : > { %v4442_v18 = vpop.f32.mrf.mxu1 }
 0xfd6   : > { %v3718_v19 = vpop.f32.mrf.mxu1 }
 0xfd8   : > { %v2289_v21 = vpop.f32.mrf.mxu1 }
 0xfd9   : > { %v2290_v22 = vadd.f32 %v2289_v21, %v4306_v20  ;;  %v2557_v21 = vld [vmem:[#allocation6 + $0x368] sm:$0xff] }
 0xfda   : > { %v3723_v23 = vpop.f32.mrf.mxu1 }
 0xfdb   : > { %v2293_v24 = vsel %vm966_vm2, %v2290_v22, -inf  ;;  %v2556_v23 = vld [vmem:[#allocation6 + $0x360] sm:$0xff] }
 0xfdc   : > { %2294 = vmax.xlane.f32.xlu1 %v2293_v24  ;;  %v2558_v24 = vld [vmem:[#allocation6 + $0x370] sm:$0xff] }
0x1065   : > { %v2295_v25 = vpop.xlane.xlu1 %2294 }
0x1066   : > { %v2296_v26 = vsub.f32 %v2290_v22, %v2295_v25  ;;  %v2559_v22 = vld [vmem:[#allocation6 + $0x378] sm:$0xff]  ;;  %v2553_v25 = vld [vmem:[#allocation6 + $0x348] sm:$0xff] }
0x1068   : > { %v2297_v27 = vmul.f32 1.442695, %v2296_v26  ;;  %v2555_v26 = vld [vmem:[#allocation6 + $0x358] sm:$0xff] }
0x106a   : > { %3888 = vpow2.f32 %v2297_v27  ;;  %v2552_v27 = vld [vmem:[#allocation6 + $0x340] sm:$0xff] }
0x1077   : > { %v3889_v28 = vpop.eup %3888 }
0x1078   : > { %v2299_v29 = vsel %vm966_vm2, %v3889_v28, 0.0 }
0x1079   : > { %2300 = vadd.xlane.f32.xlu0 %v2299_v29  ;;  %v2549_v29 = vld [vmem:[#allocation6 + $0x328] sm:$0xff] }
0x108f   : > { %2305 = vrot.lane.b32.xlu0 %v2051_v61, %s4041_s23  ;;  %v2572_v61 = vld [vmem:[#allocation6 + $0x3e0] sm:$0xff] }
0x1090   : > { %2600 = vmatpush1.msra.mxu0 %v2572_v61  ;;  %v2517_v61 = vld [vmem:[#allocation6 + $0x228] sm:$0xff] }
0x1091   : > { %2601 = vmatprep.subr.mxu0 %v2569_v2  ;;  %v2516_v2 = vld [vmem:[#allocation6 + $0x220] sm:$0xff] }
0x1092   : > { %2602 = vmatpush1.msra.mxu0 %v2568_v7  ;;  %v2513_v7 = vld [vmem:[#allocation6 + $0x208] sm:$0xff] }
0x1093   : > { %2603 = vmatprep.subr.mxu0 %v2565_v9  ;;  %v2512_v9 = vld [vmem:[#allocation6 + $0x200] sm:$0xff] }
0x1094   : > { %2604 = vmatpush1.msra.mxu0 %v2564_v11 }
0x1102   : > { %v2301_v62 = vpop.xlane.xlu0 %2300 }
0x1103   : > { %3890 = vrcp.f32 %v2301_v62  ;;  %v2551_v62 = vld [vmem:[#allocation6 + $0x338] sm:$0xff] }
0x1106   : > { %v2306_v30 = vpop.permute.xlu0 %2305 }
0x1107   : > { %3725 = vmatpush3.msra.mxu1 %v2306_v30  ;;  %v2548_v30 = vld [vmem:[#allocation6 + $0x320] sm:$0xff] }
0x1108   : > { %3729 = vmatprep.subr.mxu1 %v4039_v4 }
0x1110   : > { %v3891_v20 = vpop.eup %3890 }
0x1111   : > { %v2303_v31 = vmul.f32 %v3891_v20, %v3889_v28  ;;  %v2554_v28 = vld [vmem:[#allocation6 + $0x350] sm:$0xff] }
0x1112   : > { %v2550_v20 = vld [vmem:[#allocation6 + $0x330] sm:$0xff] }
0x1113   : > { %3727 = vmatmul.mubr.msk.f32.vlgmr.msra.gmra.mxu1 %vm966_vm2, %v2303_v31  ;;  %v2545_v31 = vld [vmem:[#allocation6 + $0x308] sm:$0xff] }
0x1114   : > { %3761 = vmatprep.mubr.msk.f32.mxu1 %vm4040_vm0, %v4039_v4  ;;  %3730 = vmatpush3.msra.mxu1 %v2402_v32  ;;  %v2547_v32 = vld [vmem:[#allocation6 + $0x318] sm:$0xff] }
0x1115   : > { %3731 = vmatprep.subr.mxu1 %v4039_v4 }
0x1116   : > { %3732 = vmatpush3.msra.mxu1 %v2401_v33  ;;  %v2544_v33 = vld [vmem:[#allocation6 + $0x300] sm:$0xff] }
0x1117   : > { %3733 = vmatprep.subr.mxu1 %v4039_v4 }
0x1118   : > { %3734 = vmatpush3.msra.mxu1 %v2400_v34  ;;  %v2546_v34 = vld [vmem:[#allocation6 + $0x310] sm:$0xff] }
0x1119   : > { %3735 = vmatprep.subr.mxu1 %v4039_v4 }
0x111a   : > { %3736 = vmatpush3.msra.mxu1 %v2399_v37  ;;  %v2541_v37 = vld [vmem:[#allocation6 + $0x2e8] sm:$0xff] }
0x111b   : > { %3737 = vmatprep.subr.mxu1 %v4039_v4 }
0x111c   : > { %3738 = vmatpush3.msra.mxu1 %v2398_v38  ;;  %v2543_v38 = vld [vmem:[#allocation6 + $0x2f8] sm:$0xff] }
0x111d   : > { %3739 = vmatprep.subr.mxu1 %v4039_v4 }
0x111e   : > { %3740 = vmatpush3.msra.mxu1 %v2397_v39  ;;  %v2540_v39 = vld [vmem:[#allocation6 + $0x2e0] sm:$0xff] }
0x111f   : > { %3741 = vmatprep.subr.mxu1 %v4039_v4 }
0x1120   : > { %3742 = vmatpush3.msra.mxu1 %v2396_v40  ;;  %v2542_v40 = vld [vmem:[#allocation6 + $0x2f0] sm:$0xff] }
0x1121   : > { %3743 = vmatprep.subr.mxu1 %v4039_v4 }
0x1122   : > { %3744 = vmatpush3.msra.mxu1 %v2395_v35  ;;  %v2537_v35 = vld [vmem:[#allocation6 + $0x2c8] sm:$0xff] }
0x1123   : > { %3745 = vmatprep.subr.mxu1 %v4039_v4 }
0x1124   : > { %3746 = vmatpush3.msra.mxu1 %v2394_v41  ;;  %v2539_v41 = vld [vmem:[#allocation6 + $0x2d8] sm:$0xff] }
0x1125   : > { %3747 = vmatprep.subr.mxu1 %v4039_v4 }
0x1126   : > { %3748 = vmatpush3.msra.mxu1 %v2393_v42  ;;  %v2536_v42 = vld [vmem:[#allocation6 + $0x2c0] sm:$0xff] }
0x1127   : > { %3749 = vmatprep.subr.mxu1 %v4039_v4 }
0x1128   : > { %3750 = vmatpush3.msra.mxu1 %v2392_v43  ;;  %v2538_v43 = vld [vmem:[#allocation6 + $0x2d0] sm:$0xff] }
0x1129   : > { %3751 = vmatprep.subr.mxu1 %v4039_v4 }
0x112a   : > { %3752 = vmatpush3.msra.mxu1 %v2391_v45  ;;  %v2533_v45 = vld [vmem:[#allocation6 + $0x2a8] sm:$0xff] }
0x112b   : > { %3753 = vmatprep.subr.mxu1 %v4039_v4 }
0x112c   : > { %3754 = vmatpush3.msra.mxu1 %v2390_v46  ;;  %v2535_v46 = vld [vmem:[#allocation6 + $0x2b8] sm:$0xff] }
0x112d   : > { %3755 = vmatprep.subr.mxu1 %v4039_v4 }
0x112e   : > { %3756 = vmatpush3.msra.mxu1 %v2389_v47  ;;  %v2532_v47 = vld [vmem:[#allocation6 + $0x2a0] sm:$0xff] }
0x112f   : > { %3757 = vmatprep.subr.mxu1 %v4039_v4 }
0x1130   : > { %3758 = vmatpush3.msra.mxu1 %v2388_v48  ;;  %v2534_v48 = vld [vmem:[#allocation6 + $0x2b0] sm:$0xff] }
0x1131   : > { %3759 = vmatprep.subr.mxu1 %v4039_v4 }
0x1132   : > { %3760 = vmatpush3.msra.mxu1 %v2387_v49  ;;  %v2529_v49 = vld [vmem:[#allocation6 + $0x288] sm:$0xff] }
0x1133   : > { %2670 = vmatprep.subr.mxu1 %v2575_v60  ;;  %v2522_v60 = vld [vmem:[#allocation6 + $0x250] sm:$0xff] }
0x11d3   : > { %v2377_v51 = vpop.f32.mrf.mxu1 }
0x11d4   : > { %2382 = vrot.lane.b32.xlu1 %v2377_v51, %s4041_s23  ;;  %v2531_v51 = vld [vmem:[#allocation6 + $0x298] sm:$0xff] }
0x11d5   : > { %v3728_v52 = vpop.f32.mrf.mxu1 }
0x11d6   : > { %v2528_v52 = vld [vmem:[#allocation6 + $0x280] sm:$0xff] }
0x1246   : > { %v2383_v53 = vpop.permute.xlu1 %2382 }
0x1247   : > { %v2385_v54 = vsel %vm889_vm1, %v4442_v18, %v2383_v53  ;;  %v2530_v53 = vld [vmem:[#allocation6 + $0x290] sm:$0xff] }
0x1248   : > { %3762 = vmatmul.mubr.f32.vlgmr.msra.gmra.mxu1 %v2385_v54  ;;  %v2525_v54 = vld [vmem:[#allocation6 + $0x268] sm:$0xff] }
0x1249   : > { %2734 = vmatprep.mubr.f32.mxu1 %v4039_v4  ;;  %2671 = vmatpush1.msra.mxu1 %v2574_v63  ;;  %v2519_v63 = vld [vmem:[#allocation6 + $0x238] sm:$0xff] }
0x124a   : > { %2672 = vmatprep.subr.mxu1 %v2571_v5  ;;  %v2518_v5 = vld [vmem:[#allocation6 + $0x230] sm:$0xff] }
0x124b   : > { %2673 = vmatpush1.msra.mxu1 %v2570_v8  ;;  %v2515_v8 = vld [vmem:[#allocation6 + $0x218] sm:$0xff] }
0x124c   : > { %2674 = vmatprep.subr.mxu1 %v2567_v10  ;;  %v2514_v10 = vld [vmem:[#allocation6 + $0x210] sm:$0xff] }
0x124d   : > { %2675 = vmatpush1.msra.mxu1 %v2566_v12 }
0x124e   : > { %2676 = vmatprep.subr.mxu1 %v2563_v13 }
0x124f   : > { %2677 = vmatpush1.msra.mxu1 %v2562_v15 }
0x1250   : > { %2678 = vmatprep.subr.mxu1 %v2559_v22  ;;  %v2841_v22 = vld [vmem:[#allocation7 + $0x3f8] sm:$0xff] }
0x1251   : > { %2679 = vmatpush1.msra.mxu1 %v2558_v24  ;;  %v2825_v24 = vld [vmem:[#allocation7 + $0x378] sm:$0xff] }
0x1252   : > { %2680 = vmatprep.subr.mxu1 %v2555_v26  ;;  %v2792_v26 = vld [vmem:[#allocation7 + $0x270] sm:$0xff] }
0x1253   : > { %2681 = vmatpush1.msra.mxu1 %v2554_v28  ;;  %v2807_v28 = vld [vmem:[#allocation7 + $0x2e8] sm:$0xff] }
0x1254   : > { %2682 = vmatprep.subr.mxu1 %v2551_v62  ;;  %v2791_v62 = vld [vmem:[#allocation7 + $0x268] sm:$0xff] }
0x1255   : > { %2683 = vmatpush1.msra.mxu1 %v2550_v20  ;;  %v2806_v20 = vld [vmem:[#allocation7 + $0x2e0] sm:$0xff] }
0x1256   : > { %2684 = vmatprep.subr.mxu1 %v2547_v32  ;;  %v2790_v32 = vld [vmem:[#allocation7 + $0x260] sm:$0xff] }
0x1257   : > { %2685 = vmatpush1.msra.mxu1 %v2546_v34  ;;  %v2805_v34 = vld [vmem:[#allocation7 + $0x2d8] sm:$0xff] }
0x1258   : > { %2686 = vmatprep.subr.mxu1 %v2543_v38  ;;  %v2789_v38 = vld [vmem:[#allocation7 + $0x258] sm:$0xff] }
0x1259   : > { %2687 = vmatpush1.msra.mxu1 %v2542_v40  ;;  %v2804_v40 = vld [vmem:[#allocation7 + $0x2d0] sm:$0xff] }
0x125a   : > { %2688 = vmatprep.subr.mxu1 %v2539_v41  ;;  %v2788_v41 = vld [vmem:[#allocation7 + $0x250] sm:$0xff] }
0x125b   : > { %2689 = vmatpush1.msra.mxu1 %v2538_v43  ;;  %v2803_v43 = vld [vmem:[#allocation7 + $0x2c8] sm:$0xff] }
0x125c   : > { %2690 = vmatprep.subr.mxu1 %v2535_v46  ;;  %v2787_v46 = vld [vmem:[#allocation7 + $0x248] sm:$0xff] }
0x125d   : > { %2691 = vmatpush1.msra.mxu1 %v2534_v48  ;;  %v2802_v48 = vld [vmem:[#allocation7 + $0x2c0] sm:$0xff] }
0x125e   : > { %2692 = vmatprep.subr.mxu1 %v2531_v51  ;;  %v2786_v51 = vld [vmem:[#allocation7 + $0x240] sm:$0xff] }
0x125f   : > { %2693 = vmatpush1.msra.mxu1 %v2530_v53  ;;  %v2801_v53 = vld [vmem:[#allocation7 + $0x2b8] sm:$0xff] }
0x1308   : > { %v2477_v36 = vpop.f32.mrf.mxu1 }
0x1309   : > { %v2478_v56 = vadd.f32 %v3326_v55, %v2477_v36  ;;  %v2527_v55 = vld [vmem:[#allocation6 + $0x278] sm:$0xff]  ;;  %v2524_v36 = vld [vmem:[#allocation6 + $0x260] sm:$0xff] }
0x130a   : > { %v3763_v57 = vpop.f32.mrf.mxu1  ;;  %2694 = vmatprep.subr.mxu1 %v2527_v55  ;;  %v2785_v55 = vld [vmem:[#allocation7 + $0x238] sm:$0xff] }
0x130b   : > { %v2481_v58 = vadd.f32 %v2478_v56, %v4410_v50  ;;  %v2561_v50 = vld [vmem:[#allocation6 + $0x388] sm:$0xff]  ;;  %v2526_v56 = vld [vmem:[#allocation6 + $0x270] sm:$0xff] }
0x130c   : > { %2605 = vmatprep.subr.mxu0 %v2561_v50  ;;  %v2521_v57 = vld [vmem:[#allocation6 + $0x248] sm:$0xff]  ;;  %2695 = vmatpush1.msra.mxu1 %v2526_v56  ;;  %v2800_v56 = vld [vmem:[#allocation7 + $0x2b0] sm:$0xff] }
0x130d   : > { %2486 = vadd.xlane.f32.xlu1 %v2481_v58  ;;  %2606 = vmatpush1.msra.mxu0 %v2560_v14  ;;  %v3329_v14 = vld [vmem:[%s4599_s8 + $0x1] ss:$0 sm:$0xff] }
0x130e   : > { %2607 = vmatprep.subr.mxu0 %v2557_v21  ;;  %v2809_v21 = vld [vmem:[#allocation7 + $0x2f8] sm:$0xff] }
0x130f   : > { %2608 = vmatpush1.msra.mxu0 %v2556_v23  ;;  %v2793_v23 = vld [vmem:[#allocation7 + $0x278] sm:$0xff] }
0x1310   : > { %2609 = vmatprep.subr.mxu0 %v2553_v25  ;;  %v2840_v25 = vld [vmem:[#allocation7 + $0x3f0] sm:$0xff] }
0x1311   : > { %2610 = vmatpush1.msra.mxu0 %v2552_v27  ;;  %v2824_v27 = vld [vmem:[#allocation7 + $0x370] sm:$0xff] }
0x1312   : > { %2611 = vmatprep.subr.mxu0 %v2549_v29  ;;  %v2839_v29 = vld [vmem:[#allocation7 + $0x3e8] sm:$0xff] }
0x1313   : > { %2612 = vmatpush1.msra.mxu0 %v2548_v30  ;;  %v2823_v30 = vld [vmem:[#allocation7 + $0x368] sm:$0xff] }
0x1314   : > { %2613 = vmatprep.subr.mxu0 %v2545_v31  ;;  %v2838_v31 = vld [vmem:[#allocation7 + $0x3e0] sm:$0xff] }
0x1315   : > { %2614 = vmatpush1.msra.mxu0 %v2544_v33  ;;  %v2822_v33 = vld [vmem:[#allocation7 + $0x360] sm:$0xff] }
0x1316   : > { %2615 = vmatprep.subr.mxu0 %v2541_v37  ;;  %v2837_v37 = vld [vmem:[#allocation7 + $0x3d8] sm:$0xff] }
0x1317   : > { %2616 = vmatpush1.msra.mxu0 %v2540_v39  ;;  %v2821_v39 = vld [vmem:[#allocation7 + $0x358] sm:$0xff] }
0x1318   : > { %2617 = vmatprep.subr.mxu0 %v2537_v35  ;;  %v2836_v35 = vld [vmem:[#allocation7 + $0x3d0] sm:$0xff] }
0x1319   : > { %2618 = vmatpush1.msra.mxu0 %v2536_v42  ;;  %v2820_v42 = vld [vmem:[#allocation7 + $0x350] sm:$0xff] }
0x131a   : > { %2619 = vmatprep.subr.mxu0 %v2533_v45  ;;  %v2835_v45 = vld [vmem:[#allocation7 + $0x3c8] sm:$0xff] }
0x131b   : > { %2620 = vmatpush1.msra.mxu0 %v2532_v47  ;;  %v2819_v47 = vld [vmem:[#allocation7 + $0x348] sm:$0xff] }
0x131c   : > { %2621 = vmatprep.subr.mxu0 %v2529_v49  ;;  %v2834_v49 = vld [vmem:[#allocation7 + $0x3c0] sm:$0xff] }
0x131d   : > { %2622 = vmatpush1.msra.mxu0 %v2528_v52  ;;  %v2818_v52 = vld [vmem:[#allocation7 + $0x340] sm:$0xff] }
0x131e   : > { %2623 = vmatprep.subr.mxu0 %v2525_v54  ;;  %v2833_v54 = vld [vmem:[#allocation7 + $0x3b8] sm:$0xff] }
0x131f   : > { %2624 = vmatpush1.msra.mxu0 %v2524_v36  ;;  %v2817_v36 = vld [vmem:[#allocation7 + $0x338] sm:$0xff] }
0x1320   : > { %2625 = vmatprep.subr.mxu0 %v2521_v57  ;;  %v2832_v57 = vld [vmem:[#allocation7 + $0x3b0] sm:$0xff] }
0x1321   : > { %2626 = vmatpush1.msra.mxu0 %v2520_v59  ;;  %v2816_v59 = vld [vmem:[#allocation7 + $0x330] sm:$0xff] }
0x1322   : > { %2627 = vmatprep.subr.mxu0 %v2517_v61  ;;  %v2831_v61 = vld [vmem:[#allocation7 + $0x3a8] sm:$0xff] }
0x1323   : > { %2628 = vmatpush1.msra.mxu0 %v2516_v2  ;;  %v2815_v2 = vld [vmem:[#allocation7 + $0x328] sm:$0xff] }
0x1324   : > { %2629 = vmatprep.subr.mxu0 %v2513_v7  ;;  %v2830_v7 = vld [vmem:[#allocation7 + $0x3a0] sm:$0xff] }
0x1325   : > { %2630 = vmatpush1.msra.mxu0 %v2512_v9  ;;  %v2814_v9 = vld [vmem:[#allocation7 + $0x320] sm:$0xff] }
0x1326   : > { %3495 = vmatprep.subr.mxu0 %v2809_v21  ;;  %v2827_v21 = vld [vmem:[#allocation7 + $0x388] sm:$0xff] }
0x1396   : > { %v2487_v16 = vpop.xlane.xlu1 %2486 }
0x1397   : > { %v2488_v17 = vmul.f32 0.0078125, %v2487_v16  ;;  %v3330_v16 = vld [vmem:[%s4600_s9 + $0x1] ss:$0 sm:$0xff] }
0x1399   : > { %v4475_v18 = vsub.f32 %v2481_v58, %v2488_v17  ;;  %v2523_v58 = vld [vmem:[#allocation6 + $0x258] sm:$0xff] }
0x139a   : > { %2696 = vmatprep.subr.mxu1 %v2523_v58  ;;  %v2784_v58 = vld [vmem:[#allocation7 + $0x230] sm:$0xff] }
0x139b   : > { %v2490_v19 = vmul.f32 %v4475_v18, %v4475_v18  ;;  %2697 = vmatpush1.msra.mxu1 %v2522_v60  ;;  %v2799_v60 = vld [vmem:[#allocation7 + $0x2a8] sm:$0xff] }
0x139c   : > { %2698 = vmatprep.subr.mxu1 %v2519_v63  ;;  %v2783_v63 = vld [vmem:[#allocation7 + $0x228] sm:$0xff] }
0x139d   : > { %2491 = vadd.xlane.f32.xlu0 %v2490_v19  ;;  %2699 = vmatpush1.msra.mxu1 %v2518_v5  ;;  %v2798_v5 = vld [vmem:[#allocation7 + $0x2a0] sm:$0xff] }
0x139e   : > { %2700 = vmatprep.subr.mxu1 %v2515_v8  ;;  %v2782_v8 = vld [vmem:[#allocation7 + $0x220] sm:$0xff] }
0x139f   : > { %2701 = vmatpush1.msra.mxu1 %v2514_v10  ;;  %v2797_v10 = vld [vmem:[#allocation7 + $0x298] sm:$0xff] }
0x13a0   : > { %3530 = vmatprep.subr.mxu1 %v2841_v22  ;;  %v2779_v22 = vld [vmem:[#allocation7 + $0x208] sm:$0xff] }
0x1426   : > { %v2492_v11 = vpop.xlane.xlu0 %2491 }
0x1427   : > { %v2493_v12 = vmul.f32 0.0078125, %v2492_v11  ;;  %v2829_v11 = vld [vmem:[#allocation7 + $0x398] sm:$0xff] }
0x1429   : > { %v2494_v50 = vadd.f32 1e-12, %v2493_v12  ;;  %v2781_v12 = vld [vmem:[#allocation7 + $0x218] sm:$0xff] }
0x142b   : > { %3892 = vrsqrt.f32 %v2494_v50  ;;  %v2813_v50 = vld [vmem:[#allocation7 + $0x318] sm:$0xff] }
0x1438   : > { %v3893_v13 = vpop.eup %3892 }
0x1439   : > { %v2496_v15 = vmul.f32 %v3893_v13, %v4475_v18  ;;  %v2808_v18 = vld [vmem:[#allocation7 + $0x2f0] sm:$0xff] }
0x143a   : > { %v2796_v13 = vld [vmem:[#allocation7 + $0x290] sm:$0xff] }
0x143b   : > { %v2503_v17 = vmul.f32 %v3329_v14, %v2496_v15  ;;  %v2828_v14 = vld [vmem:[#allocation7 + $0x390] sm:$0xff] }
0x143c   : > { %v2780_v15 = vld [vmem:[#allocation7 + $0x210] sm:$0xff] }
0x143d   : > { %v4486_v19 = vadd.f32 %v3330_v16, %v2503_v17  ;;  %v2812_v16 = vld [vmem:[#allocation7 + $0x310] sm:$0xff]  ;;  %v2795_v17 = vld [vmem:[#allocation7 + $0x288] sm:$0xff] }
0x143f   : > { %2664 = vmatmul.mubr.f32.vlgmr.msra.gmra.mxu0 %v4486_v19  ;;  %2735 = vmatmul.mubr.f32.vlgmr.msra.gmra.mxu1 %v4486_v19 }
0x1440   : > { %3496 = vmatpush3.msra.mxu0 %v2793_v23  ;;  %3531 = vmatpush3.msra.mxu1 %v2825_v24  ;;  %v2811_v23 = vld [vmem:[#allocation7 + $0x308] sm:$0xff]  ;;  %v2794_v24 = vld [vmem:[#allocation7 + $0x280] sm:$0xff] }
0x1441   : > { %3497 = vmatprep.subr.mxu0 %v2808_v18  ;;  %3532 = vmatprep.subr.mxu1 %v2840_v25  ;;  %v2826_v18 = vld [vmem:[#allocation7 + $0x380] sm:$0xff] }
0x1442   : > { %3498 = vmatpush3.msra.mxu0 %v2792_v26  ;;  %3533 = vmatpush3.msra.mxu1 %v2824_v27  ;;  %v2778_v25 = vld [vmem:[#allocation7 + $0x200] sm:$0xff] }
0x1443   : > { %3499 = vmatprep.subr.mxu0 %v2807_v28  ;;  %3534 = vmatprep.subr.mxu1 %v2839_v29  ;;  %v2810_v26 = vld [vmem:[#allocation7 + $0x300] sm:$0xff] }
0x1444   : > { %3500 = vmatpush3.msra.mxu0 %v2791_v62  ;;  %3535 = vmatpush3.msra.mxu1 %v2823_v30  ;;  %v3331_v27 = vld [vmem:[%s4602_s11 + $0x4] sm:$0xf] }
0x1445   : > { %3501 = vmatprep.subr.mxu0 %v2806_v20  ;;  %3536 = vmatprep.subr.mxu1 %v2838_v31  ;;  %v2582_v28 = vrot.slane %v3331_v27, %v4277_v1  ;;  %v2590_v29 = vrot.slane %v3331_v27, %v4287_v6  ;;  %v2586_v62 = vrot.slane %v3331_v27, %v4283_v3 }
0x1446   : > { %3502 = vmatpush3.msra.mxu0 %v2790_v32  ;;  %3537 = vmatpush3.msra.mxu1 %v2822_v33  ;;  %v2594_v30 = vrot.slane %v3331_v27, %v1423_v44 }
0x1447   : > { %3503 = vmatprep.subr.mxu0 %v2805_v34  ;;  %3538 = vmatprep.subr.mxu1 %v2837_v37 }
0x1448   : > { %3504 = vmatpush3.msra.mxu0 %v2789_v38  ;;  %3539 = vmatpush3.msra.mxu1 %v2821_v39 }
0x1449   : > { %3505 = vmatprep.subr.mxu0 %v2804_v40  ;;  %3540 = vmatprep.subr.mxu1 %v2836_v35 }
0x144a   : > { %3506 = vmatpush3.msra.mxu0 %v2788_v41  ;;  %3541 = vmatpush3.msra.mxu1 %v2820_v42 }
0x144b   : > { %3507 = vmatprep.subr.mxu0 %v2803_v43  ;;  %3542 = vmatprep.subr.mxu1 %v2835_v45 }
0x144c   : > { %3508 = vmatpush3.msra.mxu0 %v2787_v46  ;;  %3543 = vmatpush3.msra.mxu1 %v2819_v47 }
0x144d   : > { %3509 = vmatprep.subr.mxu0 %v2802_v48  ;;  %3544 = vmatprep.subr.mxu1 %v2834_v49 }
0x144e   : > { %3510 = vmatpush3.msra.mxu0 %v2786_v51  ;;  %3545 = vmatpush3.msra.mxu1 %v2818_v52 }
0x144f   : > { %3511 = vmatprep.subr.mxu0 %v2801_v53  ;;  %3546 = vmatprep.subr.mxu1 %v2833_v54 }
0x1450   : > { %3512 = vmatpush3.msra.mxu0 %v2785_v55  ;;  %3547 = vmatpush3.msra.mxu1 %v2817_v36 }
0x1451   : > { %3513 = vmatprep.subr.mxu0 %v2800_v56  ;;  %3548 = vmatprep.subr.mxu1 %v2832_v57 }
0x1452   : > { %3514 = vmatpush3.msra.mxu0 %v2784_v58  ;;  %3549 = vmatpush3.msra.mxu1 %v2816_v59 }
0x1453   : > { %3515 = vmatprep.subr.mxu0 %v2799_v60  ;;  %3550 = vmatprep.subr.mxu1 %v2831_v61 }
0x1454   : > { %3516 = vmatpush3.msra.mxu0 %v2783_v63  ;;  %3551 = vmatpush3.msra.mxu1 %v2815_v2 }
0x1455   : > { %3517 = vmatprep.subr.mxu0 %v2798_v5  ;;  %3552 = vmatprep.subr.mxu1 %v2830_v7 }
0x1456   : > { %3518 = vmatpush3.msra.mxu0 %v2782_v8  ;;  %3553 = vmatpush3.msra.mxu1 %v2814_v9 }
0x1457   : > { %3519 = vmatprep.subr.mxu0 %v2797_v10  ;;  %3554 = vmatprep.subr.mxu1 %v2829_v11 }
0x1458   : > { %3520 = vmatpush3.msra.mxu0 %v2781_v12  ;;  %3555 = vmatpush3.msra.mxu1 %v2813_v50 }
0x1459   : > { %3521 = vmatprep.subr.mxu0 %v2796_v13  ;;  %3556 = vmatprep.subr.mxu1 %v2828_v14 }
0x145a   : > { %3522 = vmatpush3.msra.mxu0 %v2780_v15  ;;  %3557 = vmatpush3.msra.mxu1 %v2812_v16  ;;  %v3333_v15 = vld [vmem:[%s4604_s13 + $0x1] ss:$0 sm:$0xff] }
0x145b   : > { %3523 = vmatprep.subr.mxu0 %v2795_v17  ;;  %3558 = vmatprep.subr.mxu1 %v2827_v21 }
0x145c   : > { %3524 = vmatpush3.msra.mxu0 %v2779_v22  ;;  %3559 = vmatpush3.msra.mxu1 %v2811_v23 }
0x145d   : > { %3525 = vmatprep.subr.mxu0 %v2794_v24  ;;  %3560 = vmatprep.subr.mxu1 %v2826_v18 }
0x145e   : > { %3526 = vmatpush3.msra.mxu0 %v2778_v25  ;;  %3561 = vmatpush3.msra.mxu1 %v2810_v26 }
0x145f   : > { %3764 = vmatprep.subr.mxu0 %v4039_v4 }
0x14ff   : > { %v2665_v20 = vpop.f32.mrf.mxu0  ;;  %v2736_v31 = vpop.f32.mrf.mxu1 }
0x1500   : > { %v2666_v32 = vadd.f32 %v2665_v20, %v2582_v28  ;;  %v2737_v33 = vadd.f32 %v2736_v31, %v2590_v29  ;;  %v3336_v31 = vld [vmem:[%s4605_s14 + $0x1] ss:$0 sm:$0xff] }
0x1501   : > { %v2667_v34 = vpop.f32.mrf.mxu0  ;;  %v2738_v37 = vpop.f32.mrf.mxu1 }
0x1502   : > { %v2745_v38 = vmul.f32 0.044715, %v2666_v32  ;;  %v2747_v39 = vmul.f32 0.044715, %v2737_v33  ;;  %v2668_v40 = vadd.f32 %v2667_v34, %v2586_v62  ;;  %v2739_v35 = vadd.f32 %v2738_v37, %v2594_v30  ;;  %v3108_v37 = vld [vmem:[%s4607_s16 + $0x78] sm:$0xff] }
0x1503   : > { %v2741_v8 = vmul.f32 0.5, %v2666_v32  ;;  %v2743_v10 = vmul.f32 0.5, %v2737_v33 }
0x1504   : > { %v2749_v41 = vmul.f32 %v2745_v38, %v2666_v32  ;;  %v2751_v42 = vmul.f32 %v2747_v39, %v2737_v33  ;;  %v2746_v43 = vmul.f32 0.044715, %v2668_v40  ;;  %v2748_v45 = vmul.f32 0.044715, %v2739_v35  ;;  %v3904_v38 = vld [vmem:[%s4302_s26] sm:$0x1] }
0x1505   : > { %v2742_v61 = vmul.f32 0.5, %v2668_v40  ;;  %v2744_v5 = vmul.f32 0.5, %v2739_v35  ;;  %v3107_v39 = vld [vmem:[%s4607_s16 + $0x70] sm:$0xff] }
0x1506   : > { %v2753_v6 = vmul.f32 %v2749_v41, %v2666_v32  ;;  %v2755_v46 = vmul.f32 %v2751_v42, %v2737_v33  ;;  %v2750_v3 = vmul.f32 %v2746_v43, %v2668_v40  ;;  %v2752_v47 = vmul.f32 %v2748_v45, %v2739_v35  ;;  %v3104_v41 = vld [vmem:[%s4607_s16 + $0x58] sm:$0xff]  ;;  %v3103_v42 = vld [vmem:[%s4607_s16 + $0x50] sm:$0xff]  ;;  %v3102_v43 = vld [vmem:[%s4607_s16 + $0x48] sm:$0xff] }
0x1507   : > { %v3101_v45 = vld [vmem:[%s4607_s16 + $0x40] sm:$0xff] }
0x1508   : > { %v2757_v0 = vadd.f32 %v2753_v6, %v2666_v32  ;;  %v2759_v44 = vadd.f32 %v2755_v46, %v2737_v33  ;;  %v2754_v48 = vmul.f32 %v2750_v3, %v2668_v40  ;;  %v2756_v49 = vmul.f32 %v2752_v47, %v2739_v35  ;;  %v3100_v6 = vld [vmem:[%s4607_s16 + $0x38] sm:$0xff]  ;;  %v3099_v46 = vld [vmem:[%s4607_s16 + $0x30] sm:$0xff]  ;;  %v3098_v3 = vld [vmem:[%s4607_s16 + $0x28] sm:$0xff] }
0x1509   : > { %v3097_v47 = vld [vmem:[%s4607_s16 + $0x20] sm:$0xff] }
0x150a   : > { %v2758_v51 = vadd.f32 %v2754_v48, %v2668_v40  ;;  %v2760_v52 = vadd.f32 %v2756_v49, %v2739_v35  ;;  %v2761_v53 = vmul.f32 0.7978846, %v2757_v0  ;;  %v2763_v54 = vmul.f32 0.7978846, %v2759_v44  ;;  %v3106_v40 = vld [vmem:[%s4607_s16 + $0x68] sm:$0xff]  ;;  %v3105_v35 = vld [vmem:[%s4607_s16 + $0x60] sm:$0xff] }
0x150b   : > { %v3096_v0 = vld [vmem:[%s4607_s16 + $0x18] sm:$0xff]  ;;  %v3095_v44 = vld [vmem:[%s4607_s16 + $0x10] sm:$0xff]  ;;  %v3094_v48 = vld [vmem:[%s4607_s16 + $0x8] sm:$0xff] }
0x150c   : > { %v2762_v55 = vmul.f32 0.7978846, %v2758_v51  ;;  %v2764_v36 = vmul.f32 0.7978846, %v2760_v52  ;;  %3894 = vtanh.f32 %v2761_v53  ;;  %v3093_v49 = vld [vmem:[%s4607_s16] sm:$0xff] }
0x150d   : > { %3896 = vtanh.f32 %v2763_v54  ;;  %v3109_v53 = vld [vmem:[%s4608_s17] sm:$0x1] }
0x150e   : > { %3898 = vtanh.f32 %v2762_v55 }
0x150f   : > { %3900 = vtanh.f32 %v2764_v36 }
0x1519   : > { %v3895_v56 = vpop.eup %3894 }
0x151a   : > { %v3897_v57 = vpop.eup %3896  ;;  %v2769_v59 = vadd.f32 1.0, %v3895_v56 }
0x151b   : > { %v3899_v58 = vpop.eup %3898  ;;  %v2771_v2 = vadd.f32 1.0, %v3897_v57 }
0x151c   : > { %v3901_v60 = vpop.eup %3900  ;;  %v2770_v63 = vadd.f32 1.0, %v3899_v58  ;;  %v2773_v12 = vmul.f32 %v2769_v59, %v2741_v8 }
0x151d   : > { %v2772_v7 = vadd.f32 1.0, %v3901_v60  ;;  %v2775_v50 = vmul.f32 %v2771_v2, %v2743_v10 }
0x151e   : > { %v2774_v9 = vmul.f32 %v2770_v63, %v2742_v61 }
0x151f   : > { %v2776_v11 = vmul.f32 %v2772_v7, %v2744_v5 }
0x1520   : > { %2914 = vmatprep.mubr.f32.mxu0 %v2774_v9 }
0x1521   : > { %2984 = vmatprep.mubr.f32.mxu1 %v2776_v11  ;;  %2915 = vmatmul.mubr.f32.vlgmr.msra.gmra.mxu0 %v2773_v12 }
0x1522   : > { %2985 = vmatmul.mubr.f32.vlgmr.msra.gmra.mxu1 %v2775_v50  ;;  %3766 = vmatprep.mubr.msk.f32.mxu0 %vm4040_vm0, %v4039_v4 }
0x15e1   : > { %v3527_v13 = vpop.f32.mrf.mxu0 }
0x15e2   : > { %v3562_v14 = vpop.f32.mrf.mxu1 }
0x15e3   : > { %v3528_v16 = vpop.f32.mrf.mxu0 }
0x15e4   : > { %v3529_v17 = vadd.f32 %v3528_v16, %v3527_v13  ;;  %v3563_v21 = vpop.f32.mrf.mxu1 }
0x15e5   : > { %v3564_v23 = vadd.f32 %v3563_v21, %v3562_v14 }
0x15e6   : > { %v2917_v22 = vadd.f32 %v3529_v17, %v3333_v15 }
0x15e8   : > { %v2987_v24 = vadd.f32 %v3564_v23, %v2917_v22 }
0x15ea   : > { %v2990_v18 = vadd.f32 %v2987_v24, %v4486_v19  ;;  %v3337_v19 = vld [vmem:[%s4606_s15 + $0x1] ss:$0 sm:$0xff] }
0x15ec   : > { %2995 = vadd.xlane.f32.xlu0 %v2990_v18 }
0x1675   : > { %v2996_v25 = vpop.xlane.xlu0 %2995 }
0x1676   : > { %v2997_v26 = vmul.f32 0.0078125, %v2996_v25 }
0x1678   : > { %v2998_v27 = vsub.f32 %v2990_v18, %v2997_v26 }
0x167a   : > { %v2999_v28 = vmul.f32 %v2998_v27, %v2998_v27 }
0x167c   : > { %3000 = vadd.xlane.f32.xlu1 %v2999_v28 }
0x1705   : > { %v3001_v29 = vpop.xlane.xlu1 %3000 }
0x1706   : > { %v3002_v62 = vmul.f32 0.0078125, %v3001_v29 }
0x1708   : > { %v3003_v30 = vadd.f32 1e-12, %v3002_v62 }
0x170a   : > { %3902 = vrsqrt.f32 %v3003_v30 }
0x1717   : > { %v3903_v20 = vpop.eup %3902 }
0x1718   : > { %v3005_v32 = vmul.f32 %v3903_v20, %v2998_v27 }
0x171a   : > { %v3012_v33 = vmul.f32 %v3336_v31, %v3005_v32 }
0x171c   : > { %v3019_v34 = vadd.f32 %v3337_v19, %v3012_v33 }
0x171e   : > { %3765 = vmatpush3.msra.mxu0 %v3019_v34 }
0x171f   : > { %3767 = vmatmul.mubr.msk.f32.vlgmr.msra.gmra.mxu0 %vm966_vm2, %v3904_v38  ;;  %3769 = vmatprep.subr.mxu0 %v4039_v4 }
0x1720   : > { %3770 = vmatpush3.msra.mxu0 %v3108_v37  ;;  %3801 = vmatprep.mubr.msk.f32.mxu0 %vm4040_vm0, %v4039_v4 }
0x1721   : > { %3771 = vmatprep.subr.mxu0 %v4039_v4 }
0x1722   : > { %3772 = vmatpush3.msra.mxu0 %v3107_v39 }
0x1723   : > { %3773 = vmatprep.subr.mxu0 %v4039_v4 }
0x1724   : > { %3774 = vmatpush3.msra.mxu0 %v3106_v40 }
0x1725   : > { %3775 = vmatprep.subr.mxu0 %v4039_v4 }
0x1726   : > { %3776 = vmatpush3.msra.mxu0 %v3105_v35 }
0x1727   : > { %3777 = vmatprep.subr.mxu0 %v4039_v4 }
0x1728   : > { %3778 = vmatpush3.msra.mxu0 %v3104_v41 }
0x1729   : > { %3779 = vmatprep.subr.mxu0 %v4039_v4 }
0x172a   : > { %3780 = vmatpush3.msra.mxu0 %v3103_v42 }
0x172b   : > { %3781 = vmatprep.subr.mxu0 %v4039_v4 }
0x172c   : > { %3782 = vmatpush3.msra.mxu0 %v3102_v43 }
0x172d   : > { %3783 = vmatprep.subr.mxu0 %v4039_v4 }
0x172e   : > { %3784 = vmatpush3.msra.mxu0 %v3101_v45 }
0x172f   : > { %3785 = vmatprep.subr.mxu0 %v4039_v4 }
0x1730   : > { %3786 = vmatpush3.msra.mxu0 %v3100_v6 }
0x1731   : > { %3787 = vmatprep.subr.mxu0 %v4039_v4 }
0x1732   : > { %3788 = vmatpush3.msra.mxu0 %v3099_v46 }
0x1733   : > { %3789 = vmatprep.subr.mxu0 %v4039_v4 }
0x1734   : > { %3790 = vmatpush3.msra.mxu0 %v3098_v3 }
0x1735   : > { %3791 = vmatprep.subr.mxu0 %v4039_v4 }
0x1736   : > { %3792 = vmatpush3.msra.mxu0 %v3097_v47 }
0x1737   : > { %3793 = vmatprep.subr.mxu0 %v4039_v4 }
0x1738   : > { %3794 = vmatpush3.msra.mxu0 %v3096_v0 }
0x1739   : > { %3795 = vmatprep.subr.mxu0 %v4039_v4 }
0x173a   : > { %3796 = vmatpush3.msra.mxu0 %v3095_v44 }
0x173b   : > { %3797 = vmatprep.subr.mxu0 %v4039_v4 }
0x173c   : > { %3798 = vmatpush3.msra.mxu0 %v3094_v48 }
0x173d   : > { %3799 = vmatprep.subr.mxu0 %v4039_v4 }
0x173e   : > { %3800 = vmatpush3.msra.mxu0 %v3093_v49 }
0x17df   : > { %v3089_v51 = vpop.f32.mrf.mxu0 }
0x17e0   : > { %3802 = vmatmul.mubr.f32.vlgmr.msra.gmra.mxu0 %v3089_v51 }
0x17e1   : > { %v3768_v52 = vpop.f32.mrf.mxu0 }
0x18a0   : > { %v3176_v54 = vpop.f32.mrf.mxu0 }
0x18a1   : > { %v3177_v55 = vadd.f32 %v3176_v54, %v3109_v53 }
0x18a2   : > { %v3803_v36 = vpop.f32.mrf.mxu0 }
0x18a3   : > { %v3180_v56 = vmax.f32 %v3177_v55, 0.0 }
0x18a5   : > { %v3184_v4 = vrot.slane %v3180_v56, %v4277_v1 }
0x18a7   : > { %3185 = vst [vmem:[%s643_s24] sm:$0xff] %v3184_v4 }
0x18a8 PF: > { %s31_s27 = sadd.s32 1, %s4027_s27  }
0x18a9   : > { %p28_p2 = scmp.ge.s32.totalorder %s31_s27, 4  }
0x18ab   :  { %30 = sbr.rel (!%p28_p2) target bundleno = 7 (0x7), region = 154 }
0x18b0   :  { %3205 = vsyncpa [#allocation3], 1 }
0x18b1   :  { %3207 = vsyncpa [#allocation3 + $0x1], 1 }
0x18b2   :  { %3208 = vsyncpa [#allocation5], 1 }
0x18b3   :  { %3209 = vsyncpa [#allocation8], 1 }

</bundles_post_ra>
